<compile_context>
chip_gen: v5e
topology: v5e:2x2
jax: 0.10.0
libtpu: 0.0.40
codegen_flags: <defaults>
</compile_context>

<pallas_src>
import jax
import jax.numpy as jnp
import numpy as np
from jax.experimental import pallas as pl
from jax.experimental.pallas import tpu as pltpu


# ------------------------------- kernel --------------------------------------

def grud_kernel(
    X_ref, m_ref, xl_ref, dm_ref, emp_ref,            # streamed data (time-major chunks)
    wgx_ref, bgx_ref,                                  # diagonal temporal decay (x)
    Wdm_ref, Wx_ref, bfused_ref,                       # fused h-independent projection
    W4_ref, bhhn_ref,                                  # recurrence params
    Wcls_ref, bcls_ref,                                # classifier params
    pred_ref, hout_ref,                                # outputs (blocked on batch)
    gamma_s, gi_s, h_s,                                # VMEM scratch
):
    t_idx = pl.program_id(1)
    Tc, Bb, F = X_ref.shape
    G = gamma_s.shape[-1]          # padded per-gate lane width (multiple of 128)
    TG = gi_s.shape[-1]            # 3 * G
    N = Tc * Bb
    mxu_dtype = Wdm_ref.dtype      # bf16 (fast) or f32 (bit-tight)

    # ---------------- h-independent precompute for this chunk ----------------
    dm = dm_ref[...]                                    # (Tc, Bb, 2F) = [d | m]
    d = dm[:, :, :F]
    m = m_ref[...]
    gamma_x = jnp.exp(-jnp.maximum(d * wgx_ref[...] + bgx_ref[...], 0.0))
    x_h = gamma_x * xl_ref[...] + (1.0 - gamma_x) * emp_ref[...][None]
    x_rep = m * X_ref[...] + (1.0 - m) * x_h            # (Tc, Bb, F)

    # head cols [:G]  = d @ Wgh^T + bgh                     (gamma_h pre-activation)
    # head cols [G:]  = m @ Wm + b_ih (+ b_hh for r/z)      (gi, missing x_rep part)
    head = (jnp.dot(dm.reshape(N, 2 * F).astype(mxu_dtype), Wdm_ref[...],
                    preferred_element_type=jnp.float32)
            + bfused_ref[...])                                        # (N, 4G) f32
    gi_x = jnp.dot(x_rep.reshape(N, F).astype(mxu_dtype), Wx_ref[...],
                   preferred_element_type=jnp.float32)                # (N, 3G) f32

    gamma_s[...] = jnp.exp(-jnp.maximum(head[:, :G], 0.0)).reshape(Tc, Bb, G)
    gi_s[...] = (head[:, G:] + gi_x).reshape(Tc, Bb, TG)

    # ---------------- serial recurrence (only h-dependent work) --------------
    @pl.when(t_idx == 0)
    def _():
        h_s[...] = jnp.zeros_like(h_s)

    bhh_n = jnp.broadcast_to(bhhn_ref[...], (Bb, G))    # hoisted broadcast

    def step(i, h):
        hd = h * gamma_s[i]                                             # (Bb, G)
        # W4 = [Wih_h_r + Whh_r | Wih_h_z + Whh_z | Wih_h_n | Whh_n]   (G, 4G)
        hW = jnp.dot(hd, W4_ref[...], preferred_element_type=jnp.float32)
        gi = gi_s[i]                                                    # (Bb, 3G)
        rz = jax.nn.sigmoid(gi[:, :2 * G] + hW[:, :2 * G])
        r, z = rz[:, :G], rz[:, G:]
        n = jnp.tanh(gi[:, 2 * G:] + hW[:, 2 * G:3 * G]
                     + r * (hW[:, 3 * G:] + bhh_n))
        return (1.0 - z) * n + z * hd

    # Unroll only amortises loop overhead (the recurrence is a serial chain).
    h_s[...] = jax.lax.fori_loop(0, Tc, step, h_s[...],
                                 unroll=True if Tc <= 8 else 2)

    # ---------------- classifier + softmax(dim=1) on the last time chunk -----
    @pl.when(t_idx == pl.num_programs(1) - 1)
    def _():
        h = h_s[...]
        hout_ref[...] = h
        logits = (jnp.dot(h, Wcls_ref[...], preferred_element_type=jnp.float32)
                  + bcls_ref[...])
        logits = logits - jnp.max(logits, axis=1, keepdims=True)
        e = jnp.exp(logits)
        pred_ref[...] = e / jnp.sum(e, axis=1, keepdims=True)   # exact normalization


# ------------------------------- wrapper --------------------------------------

def _round_up(x, m):
    return ((x + m - 1) // m) * m


def _largest_divisor_leq(n, cap):
    for d in range(min(n, cap), 0, -1):
        if n % d == 0:
            return d
    return 1


def grud_forward(X, missing_mask, deltas, empirical_mean, X_filledLOCF, packed,
                 *, t_chunk=None, b_chunk=None):
    """Batch-major (B, T, F) inputs -> (classification_pred (B, C), hidden (B, H))."""
    B, T, F = X.shape
    H, G = packed["H"], packed["G"]
    C = packed["Wcls_p"].shape[1]

    if t_chunk is None:
        t_chunk = _largest_divisor_leq(T, 16)
    assert T % t_chunk == 0
    if b_chunk is None:
        # Split the batch for megacore (v7x) when it stays sublane-aligned.
        b_chunk = B // 2 if (B >= 16 and B % 16 == 0) else B
    assert B % b_chunk == 0 and (b_chunk % 8 == 0 or b_chunk == B)
    n_b, n_t = B // b_chunk, T // t_chunk

    # Time-major layouts so the precompute matmuls directly produce time-major
    # activations indexed contiguously by the recurrence.  [d | m] is
    # concatenated on the host so the fused projection needs no in-kernel
    # lane-unaligned concat.
    Xtm = jnp.transpose(X, (1, 0, 2))
    Mtm = jnp.transpose(missing_mask, (1, 0, 2))
    Ltm = jnp.transpose(X_filledLOCF, (1, 0, 2))
    DMtm = jnp.transpose(jnp.concatenate([deltas, missing_mask], axis=-1), (1, 0, 2))

    def seq_spec(last):
        return pl.BlockSpec((t_chunk, b_chunk, last), lambda b, t: (t, b, 0))

    def full2d(arr):
        return pl.BlockSpec(arr.shape, lambda b, t: (0, 0))

    in_specs = [
        seq_spec(F), seq_spec(F), seq_spec(F), seq_spec(2 * F),
        pl.BlockSpec((b_chunk, F), lambda b, t: (b, 0)),
        full2d(packed["wgx"]), full2d(packed["bgx"]),
        full2d(packed["Wdm_p"]), full2d(packed["Wx_p"]), full2d(packed["bfused"]),
        full2d(packed["W4"]), full2d(packed["bhh_n"]),
        full2d(packed["Wcls_p"]), full2d(packed["bcls"]),
    ]
    out_specs = (
        pl.BlockSpec((b_chunk, C), lambda b, t: (b, 0)),
        pl.BlockSpec((b_chunk, G), lambda b, t: (b, 0)),
    )

    # VMEM cap: 75% of physical capacity (v7x: 64 MiB -> 48 MiB; v5e/v6e: 96 MiB).
    try:
        vmem_limit = int(pltpu.get_tpu_info().vmem_capacity_bytes * 0.75)
    except Exception:
        vmem_limit = 48 * 1024 * 1024

    flops = (2 * T * B * 2 * F * 4 * G      # fused [d|m] projection
             + 2 * T * B * F * 3 * G        # x_rep projection
             + 2 * T * B * G * 4 * G        # recurrence h @ W4
             + 2 * B * G * C                # classifier
             + 10 * T * B * F + 8 * T * B * G)
    transcendentals = T * B * (F + 4 * G) + B * C
    w_bytes = sum(int(np.prod(packed[k].shape)) * packed[k].dtype.itemsize
                  for k in ("Wdm_p", "Wx_p", "bfused", "W4", "bhh_n",
                            "Wcls_p", "bcls", "wgx", "bgx"))
    bytes_accessed = 4 * (5 * T * B * F + n_t * B * F + B * (C + G)) \
        + n_b * n_t * w_bytes

    pred, hidden_p = pl.pallas_call(
        grud_kernel,
        out_shape=(
            jax.ShapeDtypeStruct((B, C), jnp.float32),
            jax.ShapeDtypeStruct((B, G), jnp.float32),
        ),
        grid_spec=pltpu.PrefetchScalarGridSpec(
            num_scalar_prefetch=0,
            grid=(n_b, n_t),
            in_specs=in_specs,
            out_specs=out_specs,
            scratch_shapes=[
                pltpu.VMEM((t_chunk, b_chunk, G), jnp.float32),      # gamma_h
                pltpu.VMEM((t_chunk, b_chunk, 3 * G), jnp.float32),  # gi_in
                pltpu.VMEM((b_chunk, G), jnp.float32),               # carried h
            ]),
        compiler_params=pltpu.CompilerParams(
            dimension_semantics=("parallel", "arbitrary"),
            vmem_limit_bytes=vmem_limit),
        cost_estimate=pl.CostEstimate(
            flops=int(flops),
            transcendentals=int(transcendentals),
            bytes_accessed=int(bytes_accessed)),
    )(Xtm, Mtm, Ltm, DMtm, empirical_mean,
      packed["wgx"], packed["bgx"],
      packed["Wdm_p"], packed["Wx_p"], packed["bfused"],
      packed["W4"], packed["bhh_n"],
      packed["Wcls_p"], packed["bcls"])
    return pred, hidden_p[:, :H]


# --------------------------- parameter handling ------------------------------

def init_params(key, n_features, hidden, n_classes):
    """Raw parameters in torch layouts (for the pure-JAX reference)."""
    F, H, C = n_features, hidden, n_classes
    in_gru = 2 * F + H
    keys = jax.random.split(key, 12)

    def u(k, shape, bound):
        return jax.random.uniform(k, shape, jnp.float32, -bound, bound)

    Wgh = u(keys[0], (H, F), 1.0 / np.sqrt(F))          # TemporalDecay h
    bgh = u(keys[1], (H,), 1.0 / np.sqrt(F))
    Wgx = u(keys[2], (F, F), 1.0 / np.sqrt(F))          # TemporalDecay x (diag)
    wgx_diag = jnp.diagonal(Wgx)
    bgx = u(keys[3], (F,), 1.0 / np.sqrt(F))
    k = 1.0 / np.sqrt(H)
    Wih = u(keys[4], (3 * H, in_gru), k)                # GRUCell, gate order [r|z|n]
    Whh = u(keys[5], (3 * H, H), k)
    bih = u(keys[6], (3 * H,), k)
    bhh = u(keys[7], (3 * H,), k)
    kc = 1.0 / np.sqrt(H)
    Wcls = u(keys[8], (C, H), kc)                       # classifier
    bcls = u(keys[9], (C,), kc)

    return {"Wgh": Wgh, "bgh": bgh, "wgx_diag": wgx_diag, "bgx": bgx,
            "Wih": Wih, "Whh": Whh, "bih": bih, "bhh": bhh,
            "Wcls": Wcls, "bcls": bcls}


def pack_params(p, n_features, hidden, n_classes, matmul_dtype=jnp.bfloat16):
    """Pre-transpose + lane-pad + fuse parameters for the kernel.

    Gate blocks are padded from H to G = round_up(H, 128) lanes (zero padding
    keeps the padded part of the hidden state exactly 0 for all t).
    `matmul_dtype` applies only to the hoisted, one-shot projections; the
    recurrence / classifier weights stay float32.
    """
    F, H, C = n_features, hidden, n_classes
    G = _round_up(H, 128)

    def pad_gate_cols(W3h):                    # (in, 3H) -> (in, 3G)
        in_dim = W3h.shape[0]
        out = jnp.zeros((in_dim, 3 * G), jnp.float32)
        for g in range(3):
            out = out.at[:, g * G:g * G + H].set(W3h[:, g * H:(g + 1) * H])
        return out

    def pad_cols(W, width):
        return jnp.pad(W, ((0, 0), (0, width - W.shape[1])))

    def pad_rows(W, rows):
        return jnp.pad(W, ((0, rows - W.shape[0]), (0, 0)))

    # Fused h-independent projection. Head column layout: [gamma | gi_r | gi_z | gi_n].
    Wgh_p = pad_cols(p["Wgh"].T, G)                       # (F, G)
    Wih_T = p["Wih"].T                                    # (2F+H, 3H)
    Wx_T, Wh_T, Wm_T = Wih_T[:F], Wih_T[F:F + H], Wih_T[F + H:]
    Wm_p = pad_gate_cols(Wm_T)                            # (F, 3G)
    Wx_p = pad_gate_cols(Wx_T).astype(matmul_dtype)       # (F, 3G)

    Wdm = jnp.zeros((2 * F, 4 * G), jnp.float32)
    Wdm = Wdm.at[:F, :G].set(Wgh_p)                       # d rows -> gamma_h cols
    Wdm = Wdm.at[F:, G:].set(Wm_p)                        # m rows -> gi cols
    Wdm_p = Wdm.astype(matmul_dtype)                      # (2F, 4G)

    # Fused bias: gamma gets bgh; r/z gi columns absorb b_hh (sigmoid(gi+gh));
    # the n column only takes b_ih (b_hh_n stays inside the r*(...) term).
    bih_p = pad_gate_cols(p["bih"][None, :])              # (1, 3G)
    bhh_p = pad_gate_cols(p["bhh"][None, :])              # (1, 3G)
    bfused = jnp.concatenate(
        [pad_cols(p["bgh"][None, :], G),
         bih_p[:, :2 * G] + bhh_p[:, :2 * G],
         bih_p[:, 2 * G:]], axis=1)                       # (1, 4G) f32
    bhh_n = bhh_p[:, 2 * G:]                              # (1, G)

    # Recurrence weight: r/z h-matmuls merged, n gate split.
    Wh_p = pad_rows(pad_gate_cols(Wh_T), G)               # (G, 3G)  W_ih (h part)
    Whh_p = pad_rows(pad_gate_cols(p["Whh"].T), G)        # (G, 3G)  W_hh
    W4 = jnp.concatenate(
        [Wh_p[:, :2 * G] + Whh_p[:, :2 * G],
         Wh_p[:, 2 * G:], Whh_p[:, 2 * G:]], axis=1)      # (G, 4G) f32

    wgx = p["wgx_diag"][None, :]                          # (1, F)
    bgx = p["bgx"][None, :]                               # (1, F)
    Wcls_p = pad_rows(p["Wcls"].T, G)                     # (G, C)
    bcls = p["bcls"][None, :]                             # (1, C)

    return {"H": H, "G": G, "wgx": wgx, "bgx": bgx,
            "Wdm_p": Wdm_p, "Wx_p": Wx_p, "bfused": bfused,
            "W4": W4, "bhh_n": bhh_n, "Wcls_p": Wcls_p, "bcls": bcls}


# --------------------------- pure-JAX reference ------------------------------

def grud_reference(X, m, d, emp, xl, p):
    """Replicates BackboneGRUD + classifier + softmax with raw torch-layout params."""
    B, T, F = X.shape
    H = p["Whh"].shape[1]
    h = jnp.zeros((B, H), jnp.float32)
    for t in range(T):
        xt, mt, dt, lt = X[:, t], m[:, t], d[:, t], xl[:, t]
        gamma_h = jnp.exp(-jnp.maximum(dt @ p["Wgh"].T + p["bgh"], 0.0))
        gamma_x = jnp.exp(-jnp.maximum(dt * p["wgx_diag"] + p["bgx"], 0.0))
        h = h * gamma_h
        x_h = gamma_x * lt + (1 - gamma_x) * emp
        x_rep = mt * xt + (1 - mt) * x_h
        inp = jnp.concatenate([x_rep, h, mt], axis=1)
        gi = inp @ p["Wih"].T + p["bih"]
        gh = h @ p["Whh"].T + p["bhh"]
        r = jax.nn.sigmoid(gi[:, :H] + gh[:, :H])
        z = jax.nn.sigmoid(gi[:, H:2 * H] + gh[:, H:2 * H])
        n = jnp.tanh(gi[:, 2 * H:] + r * gh[:, 2 * H:])
        h = (1 - z) * n + z * h
    logits = h @ p["Wcls"].T + p["bcls"]
    return jax.nn.softmax(logits, axis=1), h


# ------------------------------------ demo -----------------------------------

if __name__ == "__main__":
    B, T, F, H, C = 8, 8, 16, 32, 4   # batch, n_steps, n_features, rnn_hidden_size, n_classes

    key = jax.random.PRNGKey(0)
    kx, km, kd, kp = jax.random.split(key, 4)

    X = jax.random.normal(kx, (B, T, F), jnp.float32)
    missing_mask = (jax.random.uniform(km, (B, T, F)) > 0.3).astype(jnp.float32)
    deltas = jax.random.uniform(kd, (B, T, F), jnp.float32, 0.0, 2.0)
    X_filledLOCF = X * missing_mask  # synthetic LOCF-filled input
    empirical_mean = jnp.broadcast_to(jnp.mean(X, axis=(0, 1))[None, :], (B, F))

    raw_params = init_params(kp, F, H, C)
    pred_ref, hidden_ref = grud_reference(X, missing_mask, deltas,
                                          empirical_mean, X_filledLOCF, raw_params)

    # 1) f32 MXU operands: bit-tight structural check of the fused/streamed
    #    kernel (t_chunk=4 -> 2 time chunks, exercising the carried h scratch).
    packed_f32 = pack_params(raw_params, F, H, C, matmul_dtype=jnp.float32)
    pred32, hid32 = grud_forward(X, missing_mask, deltas, empirical_mean,
                                 X_filledLOCF, packed_f32, t_chunk=4)
    jax.block_until_ready(pred32)
    np.testing.assert_allclose(np.asarray(hid32), np.asarray(hidden_ref),
                               rtol=1e-4, atol=1e-5)
    np.testing.assert_allclose(np.asarray(pred32), np.asarray(pred_ref),
                               rtol=1e-4, atol=1e-5)

    # 2) bf16 MXU operands for the hoisted projections (fast path): the looser
    #    tolerance reflects bf16 rounding of the one-shot projections only
    #    (the recurrence itself stays f32).
    packed_bf16 = pack_params(raw_params, F, H, C, matmul_dtype=jnp.bfloat16)
    pred16, hid16 = grud_forward(X, missing_mask, deltas, empirical_mean,
                                 X_filledLOCF, packed_bf16, t_chunk=4)
    jax.block_until_ready(pred16)
    np.testing.assert_allclose(np.asarray(hid16), np.asarray(hidden_ref),
                               rtol=5e-2, atol=5e-2)
    np.testing.assert_allclose(np.asarray(pred16), np.asarray(pred_ref),
                               rtol=5e-2, atol=2e-2)

    assert pred16.shape == (B, C) and hid16.shape == (B, H)
    np.testing.assert_allclose(np.asarray(pred16).sum(axis=1), 1.0, atol=1e-5)

    print("KERNEL_OK")
</pallas_src>

<mosaic_0001>
module attributes {stable_mosaic.version = 11 : i64} {
  func.func @grud_kernel(%arg0: i32, %arg1: i32, %arg2: memref<4x8x16xf32, #tpu.memory_space<vmem>>, %arg3: memref<4x8x16xf32, #tpu.memory_space<vmem>>, %arg4: memref<4x8x16xf32, #tpu.memory_space<vmem>>, %arg5: memref<4x8x32xf32, #tpu.memory_space<vmem>>, %arg6: memref<8x16xf32, #tpu.memory_space<vmem>>, %arg7: memref<1x16xf32, #tpu.memory_space<vmem>>, %arg8: memref<1x16xf32, #tpu.memory_space<vmem>>, %arg9: memref<32x512xf32, #tpu.memory_space<vmem>>, %arg10: memref<16x384xf32, #tpu.memory_space<vmem>>, %arg11: memref<1x512xf32, #tpu.memory_space<vmem>>, %arg12: memref<128x512xf32, #tpu.memory_space<vmem>>, %arg13: memref<1x128xf32, #tpu.memory_space<vmem>>, %arg14: memref<128x4xf32, #tpu.memory_space<vmem>>, %arg15: memref<1x4xf32, #tpu.memory_space<vmem>>, %arg16: memref<8x4xf32, #tpu.memory_space<vmem>>, %arg17: memref<8x128xf32, #tpu.memory_space<vmem>>, %arg18: memref<4x8x128xf32, #tpu.memory_space<vmem>>, %arg19: memref<4x8x384xf32, #tpu.memory_space<vmem>>, %arg20: memref<8x128xf32, #tpu.memory_space<vmem>>) attributes {dimension_semantics = [#tpu.dimension_semantics<parallel>, #tpu.dimension_semantics<arbitrary>], iteration_bounds = array<i64: 1, 2>, scalar_prefetch = 0 : i64, scratch_operands = 3 : i64, tpu.core_type = #tpu.core_type<tc>, window_params = [{transform_indices = @transform_0, window_bounds = array<i64: 4, 8, 16>}, {transform_indices = @transform_1, window_bounds = array<i64: 4, 8, 16>}, {transform_indices = @transform_2, window_bounds = array<i64: 4, 8, 16>}, {transform_indices = @transform_3, window_bounds = array<i64: 4, 8, 32>}, {transform_indices = @transform_4, window_bounds = array<i64: 8, 16>}, {pipeline_mode = #tpu.pipeline_mode<synchronous>, transform_indices = @transform_5, window_bounds = array<i64: 1, 16>}, {pipeline_mode = #tpu.pipeline_mode<synchronous>, transform_indices = @transform_6, window_bounds = array<i64: 1, 16>}, {pipeline_mode = #tpu.pipeline_mode<synchronous>, transform_indices = @transform_7, window_bounds = array<i64: 32, 512>}, {pipeline_mode = #tpu.pipeline_mode<synchronous>, transform_indices = @transform_8, window_bounds = array<i64: 16, 384>}, {pipeline_mode = #tpu.pipeline_mode<synchronous>, transform_indices = @transform_9, window_bounds = array<i64: 1, 512>}, {pipeline_mode = #tpu.pipeline_mode<synchronous>, transform_indices = @transform_10, window_bounds = array<i64: 128, 512>}, {pipeline_mode = #tpu.pipeline_mode<synchronous>, transform_indices = @transform_11, window_bounds = array<i64: 1, 128>}, {pipeline_mode = #tpu.pipeline_mode<synchronous>, transform_indices = @transform_12, window_bounds = array<i64: 128, 4>}, {pipeline_mode = #tpu.pipeline_mode<synchronous>, transform_indices = @transform_13, window_bounds = array<i64: 1, 4>}, {transform_indices = @transform_14, window_bounds = array<i64: 8, 4>}, {transform_indices = @transform_15, window_bounds = array<i64: 8, 128>}]} {
    %c0 = arith.constant 0 : index
    %c0_0 = arith.constant 0 : index
    %c0_1 = arith.constant 0 : index
    %0 = vector.load %arg5[%c0, %c0_0, %c0_1] : memref<4x8x32xf32, #tpu.memory_space<vmem>>, vector<4x8x32xf32>
    %1 = vector.extract_strided_slice %0 {offsets = [0, 0, 0], sizes = [4, 8, 16], strides = [1, 1, 1]} : vector<4x8x32xf32> to vector<4x8x16xf32>
    %c0_2 = arith.constant 0 : index
    %c0_3 = arith.constant 0 : index
    %c0_4 = arith.constant 0 : index
    %2 = vector.load %arg3[%c0_2, %c0_3, %c0_4] : memref<4x8x16xf32, #tpu.memory_space<vmem>>, vector<4x8x16xf32>
    %c0_5 = arith.constant 0 : index
    %c0_6 = arith.constant 0 : index
    %3 = vector.load %arg7[%c0_5, %c0_6] : memref<1x16xf32, #tpu.memory_space<vmem>>, vector<1x16xf32>
    %4 = vector.shape_cast %3 : vector<1x16xf32> to vector<1x1x16xf32>
    %5 = vector.broadcast %4 : vector<1x1x16xf32> to vector<4x8x16xf32>
    %6 = arith.mulf %1, %5 : vector<4x8x16xf32>
    %c0_7 = arith.constant 0 : index
    %c0_8 = arith.constant 0 : index
    %7 = vector.load %arg8[%c0_7, %c0_8] : memref<1x16xf32, #tpu.memory_space<vmem>>, vector<1x16xf32>
    %8 = vector.shape_cast %7 : vector<1x16xf32> to vector<1x1x16xf32>
    %9 = vector.broadcast %8 : vector<1x1x16xf32> to vector<4x8x16xf32>
    %10 = arith.addf %6, %9 : vector<4x8x16xf32>
    %cst = arith.constant 0.000000e+00 : f32
    %11 = vector.broadcast %cst : f32 to vector<4x8x16xf32>
    %12 = arith.maximumf %10, %11 : vector<4x8x16xf32>
    %cst_9 = arith.constant 0.000000e+00 : f32
    %13 = vector.broadcast %cst_9 : f32 to vector<4x8x16xf32>
    %14 = arith.subf %13, %12 : vector<4x8x16xf32>
    %15 = math.exp %14 : vector<4x8x16xf32>
    %c0_10 = arith.constant 0 : index
    %c0_11 = arith.constant 0 : index
    %c0_12 = arith.constant 0 : index
    %16 = vector.load %arg4[%c0_10, %c0_11, %c0_12] : memref<4x8x16xf32, #tpu.memory_space<vmem>>, vector<4x8x16xf32>
    %17 = arith.mulf %15, %16 : vector<4x8x16xf32>
    %cst_13 = arith.constant 1.000000e+00 : f32
    %18 = vector.broadcast %cst_13 : f32 to vector<4x8x16xf32>
    %19 = arith.subf %18, %15 : vector<4x8x16xf32>
    %c0_14 = arith.constant 0 : index
    %c0_15 = arith.constant 0 : index
    %20 = vector.load %arg6[%c0_14, %c0_15] : memref<8x16xf32, #tpu.memory_space<vmem>>, vector<8x16xf32>
    %21 = vector.shape_cast %20 : vector<8x16xf32> to vector<1x8x16xf32>
    %22 = vector.broadcast %21 : vector<1x8x16xf32> to vector<4x8x16xf32>
    %23 = arith.mulf %19, %22 : vector<4x8x16xf32>
    %24 = arith.addf %17, %23 : vector<4x8x16xf32>
    %c0_16 = arith.constant 0 : index
    %c0_17 = arith.constant 0 : index
    %c0_18 = arith.constant 0 : index
    %25 = vector.load %arg2[%c0_16, %c0_17, %c0_18] : memref<4x8x16xf32, #tpu.memory_space<vmem>>, vector<4x8x16xf32>
    %26 = arith.mulf %2, %25 : vector<4x8x16xf32>
    %cst_19 = arith.constant 1.000000e+00 : f32
    %27 = vector.broadcast %cst_19 : f32 to vector<4x8x16xf32>
    %28 = arith.subf %27, %2 : vector<4x8x16xf32>
    %29 = arith.mulf %28, %24 : vector<4x8x16xf32>
    %30 = arith.addf %26, %29 : vector<4x8x16xf32>
    %31 = vector.shape_cast %0 : vector<4x8x32xf32> to vector<32x32xf32>
    %c0_20 = arith.constant 0 : index
    %c0_21 = arith.constant 0 : index
    %32 = vector.load %arg9[%c0_20, %c0_21] : memref<32x512xf32, #tpu.memory_space<vmem>>, vector<32x512xf32>
    %cst_22 = arith.constant dense<0.000000e+00> : vector<32x512xf32>
    %33 = tpu.matmul %31, %32, %cst_22 {dimension_numbers = #tpu.dot_dimension_numbers<[1], [0], [0], [1], [0, 0, 1, 1], [], []>} : vector<32x32xf32>, vector<32x512xf32>, vector<32x512xf32> -> vector<32x512xf32>
    %c0_23 = arith.constant 0 : index
    %c0_24 = arith.constant 0 : index
    %34 = vector.load %arg11[%c0_23, %c0_24] : memref<1x512xf32, #tpu.memory_space<vmem>>, vector<1x512xf32>
    %35 = vector.broadcast %34 : vector<1x512xf32> to vector<32x512xf32>
    %36 = arith.addf %33, %35 : vector<32x512xf32>
    %37 = vector.shape_cast %30 : vector<4x8x16xf32> to vector<32x16xf32>
    %c0_25 = arith.constant 0 : index
    %c0_26 = arith.constant 0 : index
    %38 = vector.load %arg10[%c0_25, %c0_26] : memref<16x384xf32, #tpu.memory_space<vmem>>, vector<16x384xf32>
    %cst_27 = arith.constant dense<0.000000e+00> : vector<32x384xf32>
    %39 = tpu.matmul %37, %38, %cst_27 {dimension_numbers = #tpu.dot_dimension_numbers<[1], [0], [0], [1], [0, 0, 1, 1], [], []>} : vector<32x16xf32>, vector<16x384xf32>, vector<32x384xf32> -> vector<32x384xf32>
    %40 = vector.extract_strided_slice %36 {offsets = [0, 0], sizes = [32, 128], strides = [1, 1]} : vector<32x512xf32> to vector<32x128xf32>
    %cst_28 = arith.constant 0.000000e+00 : f32
    %41 = vector.broadcast %cst_28 : f32 to vector<32x128xf32>
    %42 = arith.maximumf %40, %41 : vector<32x128xf32>
    %cst_29 = arith.constant 0.000000e+00 : f32
    %43 = vector.broadcast %cst_29 : f32 to vector<32x128xf32>
    %44 = arith.subf %43, %42 : vector<32x128xf32>
    %45 = math.exp %44 : vector<32x128xf32>
    %46 = vector.shape_cast %45 : vector<32x128xf32> to vector<4x8x128xf32>
    %c0_30 = arith.constant 0 : index
    %c0_31 = arith.constant 0 : index
    %c0_32 = arith.constant 0 : index
    %47 = vector.load %arg18[%c0_30, %c0_31, %c0_32] : memref<4x8x128xf32, #tpu.memory_space<vmem>>, vector<4x8x128xf32>
    tpu.vector_store %arg18[%c0_30, %c0_31, %c0_32], %46 {strides = array<i32>} : memref<4x8x128xf32, #tpu.memory_space<vmem>>, vector<4x8x128xf32>,
    %48 = vector.extract_strided_slice %36 {offsets = [0, 128], sizes = [32, 384], strides = [1, 1]} : vector<32x512xf32> to vector<32x384xf32>
    %49 = arith.addf %48, %39 : vector<32x384xf32>
    %50 = vector.shape_cast %49 : vector<32x384xf32> to vector<4x8x384xf32>
    %c0_33 = arith.constant 0 : index
    %c0_34 = arith.constant 0 : index
    %c0_35 = arith.constant 0 : index
    %51 = vector.load %arg19[%c0_33, %c0_34, %c0_35] : memref<4x8x384xf32, #tpu.memory_space<vmem>>, vector<4x8x384xf32>
    tpu.vector_store %arg19[%c0_33, %c0_34, %c0_35], %50 {strides = array<i32>} : memref<4x8x384xf32, #tpu.memory_space<vmem>>, vector<4x8x384xf32>,
    %c0_i32 = arith.constant 0 : i32
    %52 = arith.cmpi eq, %arg1, %c0_i32 : i32
    %53 = arith.extui %52 : i1 to i32
    %c0_i32_36 = arith.constant 0 : i32
    %54 = arith.cmpi ne, %53, %c0_i32_36 : i32
    scf.if %54 {
      %cst_82 = arith.constant 0.000000e+00 : f32
      %191 = vector.broadcast %cst_82 : f32 to vector<8x128xf32>
      %c0_83 = arith.constant 0 : index
      %c0_84 = arith.constant 0 : index
      %192 = vector.load %arg20[%c0_83, %c0_84] : memref<8x128xf32, #tpu.memory_space<vmem>>, vector<8x128xf32>
      tpu.vector_store %arg20[%c0_83, %c0_84], %191 {strides = array<i32>} : memref<8x128xf32, #tpu.memory_space<vmem>>, vector<8x128xf32>,
    } else {
    }
    %c0_37 = arith.constant 0 : index
    %c0_38 = arith.constant 0 : index
    %55 = vector.load %arg13[%c0_37, %c0_38] : memref<1x128xf32, #tpu.memory_space<vmem>>, vector<1x128xf32>
    %56 = vector.shape_cast %55 : vector<1x128xf32> to vector<1x128xf32>
    %57 = vector.broadcast %56 : vector<1x128xf32> to vector<8x128xf32>
    %c0_39 = arith.constant 0 : index
    %c0_40 = arith.constant 0 : index
    %58 = vector.load %arg20[%c0_39, %c0_40] : memref<8x128xf32, #tpu.memory_space<vmem>>, vector<8x128xf32>
    %c0_i32_41 = arith.constant 0 : i32
    %59 = arith.index_cast %c0_i32_41 : i32 to index
    %c0_42 = arith.constant 0 : index
    %c0_43 = arith.constant 0 : index
    %60 = vector.load %arg18[%59, %c0_42, %c0_43] : memref<4x8x128xf32, #tpu.memory_space<vmem>>, vector<1x8x128xf32>
    %61 = vector.shape_cast %60 : vector<1x8x128xf32> to vector<8x128xf32>
    %62 = arith.mulf %58, %61 : vector<8x128xf32>
    %c0_44 = arith.constant 0 : index
    %c0_45 = arith.constant 0 : index
    %63 = vector.load %arg12[%c0_44, %c0_45] : memref<128x512xf32, #tpu.memory_space<vmem>>, vector<128x512xf32>
    %cst_46 = arith.constant dense<0.000000e+00> : vector<8x512xf32>
    %64 = tpu.matmul %62, %63, %cst_46 {dimension_numbers = #tpu.dot_dimension_numbers<[1], [0], [0], [1], [0, 0, 1, 1], [], []>} : vector<8x128xf32>, vector<128x512xf32>, vector<8x512xf32> -> vector<8x512xf32>
    %65 = arith.index_cast %c0_i32_41 : i32 to index
    %c0_47 = arith.constant 0 : index
    %c0_48 = arith.constant 0 : index
    %66 = vector.load %arg19[%65, %c0_47, %c0_48] : memref<4x8x384xf32, #tpu.memory_space<vmem>>, vector<1x8x384xf32>
    %67 = vector.shape_cast %66 : vector<1x8x384xf32> to vector<8x384xf32>
    %68 = vector.extract_strided_slice %67 {offsets = [0, 0], sizes = [8, 256], strides = [1, 1]} : vector<8x384xf32> to vector<8x256xf32>
    %69 = vector.extract_strided_slice %64 {offsets = [0, 0], sizes = [8, 256], strides = [1, 1]} : vector<8x512xf32> to vector<8x256xf32>
    %70 = arith.addf %68, %69 : vector<8x256xf32>
    %71 = arith.negf %70 : vector<8x256xf32>
    %72 = math.exp %71 : vector<8x256xf32>
    %cst_49 = arith.constant 1.000000e+00 : f32
    %73 = vector.broadcast %cst_49 : f32 to vector<8x256xf32>
    %74 = arith.addf %73, %72 : vector<8x256xf32>
    %75 = arith.divf %73, %74 : vector<8x256xf32>
    %76 = vector.extract_strided_slice %75 {offsets = [0, 0], sizes = [8, 128], strides = [1, 1]} : vector<8x256xf32> to vector<8x128xf32>
    %77 = vector.extract_strided_slice %75 {offsets = [0, 128], sizes = [8, 128], strides = [1, 1]} : vector<8x256xf32> to vector<8x128xf32>
    %78 = vector.extract_strided_slice %67 {offsets = [0, 256], sizes = [8, 128], strides = [1, 1]} : vector<8x384xf32> to vector<8x128xf32>
    %79 = vector.extract_strided_slice %64 {offsets = [0, 256], sizes = [8, 128], strides = [1, 1]} : vector<8x512xf32> to vector<8x128xf32>
    %80 = arith.addf %78, %79 : vector<8x128xf32>
    %81 = vector.extract_strided_slice %64 {offsets = [0, 384], sizes = [8, 128], strides = [1, 1]} : vector<8x512xf32> to vector<8x128xf32>
    %82 = arith.addf %81, %57 : vector<8x128xf32>
    %83 = arith.mulf %76, %82 : vector<8x128xf32>
    %84 = arith.addf %80, %83 : vector<8x128xf32>
    %85 = math.tanh %84 : vector<8x128xf32>
    %cst_50 = arith.constant 1.000000e+00 : f32
    %86 = vector.broadcast %cst_50 : f32 to vector<8x128xf32>
    %87 = arith.subf %86, %77 : vector<8x128xf32>
    %88 = arith.mulf %87, %85 : vector<8x128xf32>
    %89 = arith.mulf %77, %62 : vector<8x128xf32>
    %90 = arith.addf %88, %89 : vector<8x128xf32>
    %c1_i32 = arith.constant 1 : i32
    %91 = arith.index_cast %c1_i32 : i32 to index
    %c0_51 = arith.constant 0 : index
    %c0_52 = arith.constant 0 : index
    %92 = vector.load %arg18[%91, %c0_51, %c0_52] : memref<4x8x128xf32, #tpu.memory_space<vmem>>, vector<1x8x128xf32>
    %93 = vector.shape_cast %92 : vector<1x8x128xf32> to vector<8x128xf32>
    %94 = arith.mulf %90, %93 : vector<8x128xf32>
    %c0_53 = arith.constant 0 : index
    %c0_54 = arith.constant 0 : index
    %95 = vector.load %arg12[%c0_53, %c0_54] : memref<128x512xf32, #tpu.memory_space<vmem>>, vector<128x512xf32>
    %cst_55 = arith.constant dense<0.000000e+00> : vector<8x512xf32>
    %96 = tpu.matmul %94, %95, %cst_55 {dimension_numbers = #tpu.dot_dimension_numbers<[1], [0], [0], [1], [0, 0, 1, 1], [], []>} : vector<8x128xf32>, vector<128x512xf32>, vector<8x512xf32> -> vector<8x512xf32>
    %97 = arith.index_cast %c1_i32 : i32 to index
    %c0_56 = arith.constant 0 : index
    %c0_57 = arith.constant 0 : index
    %98 = vector.load %arg19[%97, %c0_56, %c0_57] : memref<4x8x384xf32, #tpu.memory_space<vmem>>, vector<1x8x384xf32>
    %99 = vector.shape_cast %98 : vector<1x8x384xf32> to vector<8x384xf32>
    %100 = vector.extract_strided_slice %99 {offsets = [0, 0], sizes = [8, 256], strides = [1, 1]} : vector<8x384xf32> to vector<8x256xf32>
    %101 = vector.extract_strided_slice %96 {offsets = [0, 0], sizes = [8, 256], strides = [1, 1]} : vector<8x512xf32> to vector<8x256xf32>
    %102 = arith.addf %100, %101 : vector<8x256xf32>
    %103 = arith.negf %102 : vector<8x256xf32>
    %104 = math.exp %103 : vector<8x256xf32>
    %cst_58 = arith.constant 1.000000e+00 : f32
    %105 = vector.broadcast %cst_58 : f32 to vector<8x256xf32>
    %106 = arith.addf %105, %104 : vector<8x256xf32>
    %107 = arith.divf %105, %106 : vector<8x256xf32>
    %108 = vector.extract_strided_slice %107 {offsets = [0, 0], sizes = [8, 128], strides = [1, 1]} : vector<8x256xf32> to vector<8x128xf32>
    %109 = vector.extract_strided_slice %107 {offsets = [0, 128], sizes = [8, 128], strides = [1, 1]} : vector<8x256xf32> to vector<8x128xf32>
    %110 = vector.extract_strided_slice %99 {offsets = [0, 256], sizes = [8, 128], strides = [1, 1]} : vector<8x384xf32> to vector<8x128xf32>
    %111 = vector.extract_strided_slice %96 {offsets = [0, 256], sizes = [8, 128], strides = [1, 1]} : vector<8x512xf32> to vector<8x128xf32>
    %112 = arith.addf %110, %111 : vector<8x128xf32>
    %113 = vector.extract_strided_slice %96 {offsets = [0, 384], sizes = [8, 128], strides = [1, 1]} : vector<8x512xf32> to vector<8x128xf32>
    %114 = arith.addf %113, %57 : vector<8x128xf32>
    %115 = arith.mulf %108, %114 : vector<8x128xf32>
    %116 = arith.addf %112, %115 : vector<8x128xf32>
    %117 = math.tanh %116 : vector<8x128xf32>
    %cst_59 = arith.constant 1.000000e+00 : f32
    %118 = vector.broadcast %cst_59 : f32 to vector<8x128xf32>
    %119 = arith.subf %118, %109 : vector<8x128xf32>
    %120 = arith.mulf %119, %117 : vector<8x128xf32>
    %121 = arith.mulf %109, %94 : vector<8x128xf32>
    %122 = arith.addf %120, %121 : vector<8x128xf32>
    %c2_i32 = arith.constant 2 : i32
    %123 = arith.index_cast %c2_i32 : i32 to index
    %c0_60 = arith.constant 0 : index
    %c0_61 = arith.constant 0 : index
    %124 = vector.load %arg18[%123, %c0_60, %c0_61] : memref<4x8x128xf32, #tpu.memory_space<vmem>>, vector<1x8x128xf32>
    %125 = vector.shape_cast %124 : vector<1x8x128xf32> to vector<8x128xf32>
    %126 = arith.mulf %122, %125 : vector<8x128xf32>
    %c0_62 = arith.constant 0 : index
    %c0_63 = arith.constant 0 : index
    %127 = vector.load %arg12[%c0_62, %c0_63] : memref<128x512xf32, #tpu.memory_space<vmem>>, vector<128x512xf32>
    %cst_64 = arith.constant dense<0.000000e+00> : vector<8x512xf32>
    %128 = tpu.matmul %126, %127, %cst_64 {dimension_numbers = #tpu.dot_dimension_numbers<[1], [0], [0], [1], [0, 0, 1, 1], [], []>} : vector<8x128xf32>, vector<128x512xf32>, vector<8x512xf32> -> vector<8x512xf32>
    %129 = arith.index_cast %c2_i32 : i32 to index
    %c0_65 = arith.constant 0 : index
    %c0_66 = arith.constant 0 : index
    %130 = vector.load %arg19[%129, %c0_65, %c0_66] : memref<4x8x384xf32, #tpu.memory_space<vmem>>, vector<1x8x384xf32>
    %131 = vector.shape_cast %130 : vector<1x8x384xf32> to vector<8x384xf32>
    %132 = vector.extract_strided_slice %131 {offsets = [0, 0], sizes = [8, 256], strides = [1, 1]} : vector<8x384xf32> to vector<8x256xf32>
    %133 = vector.extract_strided_slice %128 {offsets = [0, 0], sizes = [8, 256], strides = [1, 1]} : vector<8x512xf32> to vector<8x256xf32>
    %134 = arith.addf %132, %133 : vector<8x256xf32>
    %135 = arith.negf %134 : vector<8x256xf32>
    %136 = math.exp %135 : vector<8x256xf32>
    %cst_67 = arith.constant 1.000000e+00 : f32
    %137 = vector.broadcast %cst_67 : f32 to vector<8x256xf32>
    %138 = arith.addf %137, %136 : vector<8x256xf32>
    %139 = arith.divf %137, %138 : vector<8x256xf32>
    %140 = vector.extract_strided_slice %139 {offsets = [0, 0], sizes = [8, 128], strides = [1, 1]} : vector<8x256xf32> to vector<8x128xf32>
    %141 = vector.extract_strided_slice %139 {offsets = [0, 128], sizes = [8, 128], strides = [1, 1]} : vector<8x256xf32> to vector<8x128xf32>
    %142 = vector.extract_strided_slice %131 {offsets = [0, 256], sizes = [8, 128], strides = [1, 1]} : vector<8x384xf32> to vector<8x128xf32>
    %143 = vector.extract_strided_slice %128 {offsets = [0, 256], sizes = [8, 128], strides = [1, 1]} : vector<8x512xf32> to vector<8x128xf32>
    %144 = arith.addf %142, %143 : vector<8x128xf32>
    %145 = vector.extract_strided_slice %128 {offsets = [0, 384], sizes = [8, 128], strides = [1, 1]} : vector<8x512xf32> to vector<8x128xf32>
    %146 = arith.addf %145, %57 : vector<8x128xf32>
    %147 = arith.mulf %140, %146 : vector<8x128xf32>
    %148 = arith.addf %144, %147 : vector<8x128xf32>
    %149 = math.tanh %148 : vector<8x128xf32>
    %cst_68 = arith.constant 1.000000e+00 : f32
    %150 = vector.broadcast %cst_68 : f32 to vector<8x128xf32>
    %151 = arith.subf %150, %141 : vector<8x128xf32>
    %152 = arith.mulf %151, %149 : vector<8x128xf32>
    %153 = arith.mulf %141, %126 : vector<8x128xf32>
    %154 = arith.addf %152, %153 : vector<8x128xf32>
    %c3_i32 = arith.constant 3 : i32
    %155 = arith.index_cast %c3_i32 : i32 to index
    %c0_69 = arith.constant 0 : index
    %c0_70 = arith.constant 0 : index
    %156 = vector.load %arg18[%155, %c0_69, %c0_70] : memref<4x8x128xf32, #tpu.memory_space<vmem>>, vector<1x8x128xf32>
    %157 = vector.shape_cast %156 : vector<1x8x128xf32> to vector<8x128xf32>
    %158 = arith.mulf %154, %157 : vector<8x128xf32>
    %c0_71 = arith.constant 0 : index
    %c0_72 = arith.constant 0 : index
    %159 = vector.load %arg12[%c0_71, %c0_72] : memref<128x512xf32, #tpu.memory_space<vmem>>, vector<128x512xf32>
    %cst_73 = arith.constant dense<0.000000e+00> : vector<8x512xf32>
    %160 = tpu.matmul %158, %159, %cst_73 {dimension_numbers = #tpu.dot_dimension_numbers<[1], [0], [0], [1], [0, 0, 1, 1], [], []>} : vector<8x128xf32>, vector<128x512xf32>, vector<8x512xf32> -> vector<8x512xf32>
    %161 = arith.index_cast %c3_i32 : i32 to index
    %c0_74 = arith.constant 0 : index
    %c0_75 = arith.constant 0 : index
    %162 = vector.load %arg19[%161, %c0_74, %c0_75] : memref<4x8x384xf32, #tpu.memory_space<vmem>>, vector<1x8x384xf32>
    %163 = vector.shape_cast %162 : vector<1x8x384xf32> to vector<8x384xf32>
    %164 = vector.extract_strided_slice %163 {offsets = [0, 0], sizes = [8, 256], strides = [1, 1]} : vector<8x384xf32> to vector<8x256xf32>
    %165 = vector.extract_strided_slice %160 {offsets = [0, 0], sizes = [8, 256], strides = [1, 1]} : vector<8x512xf32> to vector<8x256xf32>
    %166 = arith.addf %164, %165 : vector<8x256xf32>
    %167 = arith.negf %166 : vector<8x256xf32>
    %168 = math.exp %167 : vector<8x256xf32>
    %cst_76 = arith.constant 1.000000e+00 : f32
    %169 = vector.broadcast %cst_76 : f32 to vector<8x256xf32>
    %170 = arith.addf %169, %168 : vector<8x256xf32>
    %171 = arith.divf %169, %170 : vector<8x256xf32>
    %172 = vector.extract_strided_slice %171 {offsets = [0, 0], sizes = [8, 128], strides = [1, 1]} : vector<8x256xf32> to vector<8x128xf32>
    %173 = vector.extract_strided_slice %171 {offsets = [0, 128], sizes = [8, 128], strides = [1, 1]} : vector<8x256xf32> to vector<8x128xf32>
    %174 = vector.extract_strided_slice %163 {offsets = [0, 256], sizes = [8, 128], strides = [1, 1]} : vector<8x384xf32> to vector<8x128xf32>
    %175 = vector.extract_strided_slice %160 {offsets = [0, 256], sizes = [8, 128], strides = [1, 1]} : vector<8x512xf32> to vector<8x128xf32>
    %176 = arith.addf %174, %175 : vector<8x128xf32>
    %177 = vector.extract_strided_slice %160 {offsets = [0, 384], sizes = [8, 128], strides = [1, 1]} : vector<8x512xf32> to vector<8x128xf32>
    %178 = arith.addf %177, %57 : vector<8x128xf32>
    %179 = arith.mulf %172, %178 : vector<8x128xf32>
    %180 = arith.addf %176, %179 : vector<8x128xf32>
    %181 = math.tanh %180 : vector<8x128xf32>
    %cst_77 = arith.constant 1.000000e+00 : f32
    %182 = vector.broadcast %cst_77 : f32 to vector<8x128xf32>
    %183 = arith.subf %182, %173 : vector<8x128xf32>
    %184 = arith.mulf %183, %181 : vector<8x128xf32>
    %185 = arith.mulf %173, %158 : vector<8x128xf32>
    %186 = arith.addf %184, %185 : vector<8x128xf32>
    %c4_i32 = arith.constant 4 : i32
    %c0_78 = arith.constant 0 : index
    %c0_79 = arith.constant 0 : index
    %187 = vector.load %arg20[%c0_78, %c0_79] : memref<8x128xf32, #tpu.memory_space<vmem>>, vector<8x128xf32>
    tpu.vector_store %arg20[%c0_78, %c0_79], %186 {strides = array<i32>} : memref<8x128xf32, #tpu.memory_space<vmem>>, vector<8x128xf32>,
    %c1_i32_80 = arith.constant 1 : i32
    %188 = arith.cmpi eq, %arg1, %c1_i32_80 : i32
    %189 = arith.extui %188 : i1 to i32
    %c0_i32_81 = arith.constant 0 : i32
    %190 = arith.cmpi ne, %189, %c0_i32_81 : i32
    scf.if %190 {
      %c0_82 = arith.constant 0 : index
      %c0_83 = arith.constant 0 : index
      %191 = vector.load %arg20[%c0_82, %c0_83] : memref<8x128xf32, #tpu.memory_space<vmem>>, vector<8x128xf32>
      %c0_84 = arith.constant 0 : index
      %c0_85 = arith.constant 0 : index
      %192 = vector.load %arg17[%c0_84, %c0_85] : memref<8x128xf32, #tpu.memory_space<vmem>>, vector<8x128xf32>
      tpu.vector_store %arg17[%c0_84, %c0_85], %191 {strides = array<i32>} : memref<8x128xf32, #tpu.memory_space<vmem>>, vector<8x128xf32>,
      %c0_86 = arith.constant 0 : index
      %c0_87 = arith.constant 0 : index
      %193 = vector.load %arg14[%c0_86, %c0_87] : memref<128x4xf32, #tpu.memory_space<vmem>>, vector<128x4xf32>
      %cst_88 = arith.constant dense<0.000000e+00> : vector<8x4xf32>
      %194 = tpu.matmul %191, %193, %cst_88 {dimension_numbers = #tpu.dot_dimension_numbers<[1], [0], [0], [1], [0, 0, 1, 1], [], []>} : vector<8x128xf32>, vector<128x4xf32>, vector<8x4xf32> -> vector<8x4xf32>
      %c0_89 = arith.constant 0 : index
      %c0_90 = arith.constant 0 : index
      %195 = vector.load %arg15[%c0_89, %c0_90] : memref<1x4xf32, #tpu.memory_space<vmem>>, vector<1x4xf32>
      %196 = vector.broadcast %195 : vector<1x4xf32> to vector<8x4xf32>
      %197 = arith.addf %194, %196 : vector<8x4xf32>
      %cst_91 = arith.constant dense<0xFF800000> : vector<8xf32>
      %198 = vector.multi_reduction <maximumf>, %197, %cst_91 [1] : vector<8x4xf32> to vector<8xf32>
      %199 = vector.shape_cast %198 : vector<8xf32> to vector<8x1xf32>
      %200 = vector.broadcast %199 : vector<8x1xf32> to vector<8x4xf32>
      %201 = arith.subf %197, %200 : vector<8x4xf32>
      %202 = math.exp %201 : vector<8x4xf32>
      %cst_92 = arith.constant dense<0.000000e+00> : vector<8xf32>
      %203 = vector.multi_reduction <add>, %202, %cst_92 [1] : vector<8x4xf32> to vector<8xf32>
      %204 = vector.shape_cast %203 : vector<8xf32> to vector<8x1xf32>
      %205 = vector.broadcast %204 : vector<8x1xf32> to vector<8x4xf32>
      %206 = arith.divf %202, %205 : vector<8x4xf32>
      %c0_93 = arith.constant 0 : index
      %c0_94 = arith.constant 0 : index
      %207 = vector.load %arg16[%c0_93, %c0_94] : memref<8x4xf32, #tpu.memory_space<vmem>>, vector<8x4xf32>
      tpu.vector_store %arg16[%c0_93, %c0_94], %206 {strides = array<i32>} : memref<8x4xf32, #tpu.memory_space<vmem>>, vector<8x4xf32>,
    } else {
    }
    return
  }
  func.func @transform_0(%arg0: i32, %arg1: i32) -> (i32, i32, i32) {
    %c0_i32 = arith.constant 0 : i32
    %c0_i32_0 = arith.constant 0 : i32
    return %arg1, %arg0, %c0_i32 : i32, i32, i32
  }
  func.func @transform_1(%arg0: i32, %arg1: i32) -> (i32, i32, i32) {
    %c0_i32 = arith.constant 0 : i32
    %c0_i32_0 = arith.constant 0 : i32
    return %arg1, %arg0, %c0_i32 : i32, i32, i32
  }
  func.func @transform_2(%arg0: i32, %arg1: i32) -> (i32, i32, i32) {
    %c0_i32 = arith.constant 0 : i32
    %c0_i32_0 = arith.constant 0 : i32
    return %arg1, %arg0, %c0_i32 : i32, i32, i32
  }
  func.func @transform_3(%arg0: i32, %arg1: i32) -> (i32, i32, i32) {
    %c0_i32 = arith.constant 0 : i32
    %c0_i32_0 = arith.constant 0 : i32
    return %arg1, %arg0, %c0_i32 : i32, i32, i32
  }
  func.func @transform_4(%arg0: i32, %arg1: i32) -> (i32, i32) {
    %c0_i32 = arith.constant 0 : i32
    %c0_i32_0 = arith.constant 0 : i32
    return %arg0, %c0_i32 : i32, i32
  }
  func.func @transform_5(%arg0: i32, %arg1: i32) -> (i32, i32) {
    %c0_i32 = arith.constant 0 : i32
    %c0_i32_0 = arith.constant 0 : i32
    %c0_i32_1 = arith.constant 0 : i32
    return %c0_i32, %c0_i32_0 : i32, i32
  }
  func.func @transform_6(%arg0: i32, %arg1: i32) -> (i32, i32) {
    %c0_i32 = arith.constant 0 : i32
    %c0_i32_0 = arith.constant 0 : i32
    %c0_i32_1 = arith.constant 0 : i32
    return %c0_i32, %c0_i32_0 : i32, i32
  }
  func.func @transform_7(%arg0: i32, %arg1: i32) -> (i32, i32) {
    %c0_i32 = arith.constant 0 : i32
    %c0_i32_0 = arith.constant 0 : i32
    %c0_i32_1 = arith.constant 0 : i32
    return %c0_i32, %c0_i32_0 : i32, i32
  }
  func.func @transform_8(%arg0: i32, %arg1: i32) -> (i32, i32) {
    %c0_i32 = arith.constant 0 : i32
    %c0_i32_0 = arith.constant 0 : i32
    %c0_i32_1 = arith.constant 0 : i32
    return %c0_i32, %c0_i32_0 : i32, i32
  }
  func.func @transform_9(%arg0: i32, %arg1: i32) -> (i32, i32) {
    %c0_i32 = arith.constant 0 : i32
    %c0_i32_0 = arith.constant 0 : i32
    %c0_i32_1 = arith.constant 0 : i32
    return %c0_i32, %c0_i32_0 : i32, i32
  }
  func.func @transform_10(%arg0: i32, %arg1: i32) -> (i32, i32) {
    %c0_i32 = arith.constant 0 : i32
    %c0_i32_0 = arith.constant 0 : i32
    %c0_i32_1 = arith.constant 0 : i32
    return %c0_i32, %c0_i32_0 : i32, i32
  }
  func.func @transform_11(%arg0: i32, %arg1: i32) -> (i32, i32) {
    %c0_i32 = arith.constant 0 : i32
    %c0_i32_0 = arith.constant 0 : i32
    %c0_i32_1 = arith.constant 0 : i32
    return %c0_i32, %c0_i32_0 : i32, i32
  }
  func.func @transform_12(%arg0: i32, %arg1: i32) -> (i32, i32) {
    %c0_i32 = arith.constant 0 : i32
    %c0_i32_0 = arith.constant 0 : i32
    %c0_i32_1 = arith.constant 0 : i32
    return %c0_i32, %c0_i32_0 : i32, i32
  }
  func.func @transform_13(%arg0: i32, %arg1: i32) -> (i32, i32) {
    %c0_i32 = arith.constant 0 : i32
    %c0_i32_0 = arith.constant 0 : i32
    %c0_i32_1 = arith.constant 0 : i32
    return %c0_i32, %c0_i32_0 : i32, i32
  }
  func.func @transform_14(%arg0: i32, %arg1: i32) -> (i32, i32) {
    %c0_i32 = arith.constant 0 : i32
    %c0_i32_0 = arith.constant 0 : i32
    return %arg0, %c0_i32 : i32, i32
  }
  func.func @transform_15(%arg0: i32, %arg1: i32) -> (i32, i32) {
    %c0_i32 = arith.constant 0 : i32
    %c0_i32_0 = arith.constant 0 : i32
    return %arg0, %c0_i32 : i32, i32
  }
}

</mosaic_0001>

<bundles_post_ra>
// kernel: tpu_custom_call.1
= control target key start
LH: loop header
LB: loop body
LE: loop exit
PB: predicated region body
PF: predicated region fallthrough
CT: control target
= control target key end

     0   :  { %s3643_s0 = inlined_call_operand.hbm [shape: f32[8,8,16], index: 0, kind: input, shape index: {}]   ;;  %s3644_s1 = inlined_call_operand.hbm [shape: f32[8,8,16], index: 1, kind: input, shape index: {}]   ;;  %s3645_s2 = inlined_call_operand.hbm [shape: f32[8,8,16], index: 2, kind: input, shape index: {}]   ;;  %s3646_s3 = inlined_call_operand.hbm [shape: f32[8,8,32], index: 3, kind: input, shape index: {}]   ;;  %s3647_s4 = inlined_call_operand.vmem [shape: f32[8,16], index: 4, kind: input, shape index: {}]   ;;  %s3648_s5 = inlined_call_operand.hbm [shape: f32[1,16], index: 5, kind: input, shape index: {}]   ;;  %s3649_s6 = inlined_call_operand.hbm [shape: f32[1,16], index: 6, kind: input, shape index: {}]   ;;  %s3650_s7 = inlined_call_operand.vmem [shape: f32[32,512], index: 7, kind: input, shape index: {}]   ;;  %s3651_s8 = inlined_call_operand.hbm [shape: f32[16,384], index: 8, kind: input, shape index: {}]   ;;  %s3652_s9 = inlined_call_operand.hbm [shape: f32[1,512], index: 9, kind: input, shape index: {}]   ;;  %s3653_s10 = inlined_call_operand.hbm [shape: f32[128,512], index: 10, kind: input, shape index: {}]   ;;  %s3654_s11 = inlined_call_operand.vmem [shape: f32[1,128], index: 11, kind: input, shape index: {}]   ;;  %s3655_s12 = inlined_call_operand.vmem [shape: f32[128,4], index: 12, kind: input, shape index: {}]   ;;  %s3656_s13 = inlined_call_operand.vmem [shape: f32[1,4], index: 13, kind: input, shape index: {}]   ;;  %s3657_s14 = inlined_call_operand.vmem [shape: f32[8,4], index: 14, kind: output, shape index: {0}]   ;;  %s3658_s15 = inlined_call_operand.hbm [shape: f32[8,128], index: 15, kind: output, shape index: {1}]  }
   0x1   :  { %3698 = sst [smem:[#allocation61_spill]] %s3644_s1 }
   0x2   :  { %3699 = sst [smem:[#allocation62_spill]] %s3647_s4 }
   0x3   :  { %3700 = sst [smem:[#allocation63_spill]] %s3648_s5 }
   0x4   :  { %3701 = sst [smem:[#allocation64_spill]] %s3649_s6 }
   0x5   :  { %3702 = sst [smem:[#allocation65_spill]] %s3652_s9 }
   0x6   :  { %3703 = sst [smem:[#allocation66_spill]] %s3654_s11 }
   0x7   :  { %3704 = sst [smem:[#allocation67_spill]] %s3655_s12 }
   0x8   :  { %3705 = sst [smem:[#allocation68_spill]] %s3656_s13 }
   0x9   :  { %3706 = sst [smem:[#allocation69_spill]] %s3657_s14 }
   0xa   :  { %3707 = sst [smem:[#allocation70_spill]] %s3658_s15 }
   0xb   :  { %21 = vsyncpa [#allocation6], 0 }
   0xc   :  { %23 = vsyncpa [#allocation6 + $0x1], 0 }
   0xd   :  { %24 = vsyncpa [#allocation9], 0 }
   0xe   :  { %26 = vsyncpa [#allocation9 + $0x1], 0 }
   0xf   :  { %27 = vsyncpa [#allocation12], 0 }
  0x10   :  { %29 = vsyncpa [#allocation12 + $0x1], 0 }
  0x11   :  { %30 = vsyncpa [#allocation15], 0 }
  0x12   :  { %31 = vsyncpa [#allocation18], 0 }
  0x13   :  { %32 = vsyncpa [#allocation7], 0  ;;  %s2830_s18 = smov 0   ;;  %s2832_s19 = smov 0  }
  0x14   :  { %s2834_s20 = smov 0   ;;  %s2836_s21 = smov 0  }
  0x15   :  { %s2838_s22 = smov 0   ;;  %s2840_s23 = smov 0  }
  0x16 LB: > { %3708 = sst [smem:[#allocation28_spill]] %s2727_s21  ;;  %s2859_s24 = sadd.s32 4294967295, %s2735_s23   ;;  %s2735_s23 = sphi %s2840_s23, %s38_s23   ;;  %s2731_s22 = sphi %s2838_s22, %s3793_s22   ;;  %s2727_s21 = sphi %s2836_s21, %s3792_s21   ;;  %s2723_s20 = sphi %s2834_s20, %s3796_s20   ;;  %s2719_s19 = sphi %s2832_s19, %s3795_s19   ;;  %s2715_s18 = sphi %s2830_s18, %s3794_s18  }
  0x17   : > { %3709 = sst [smem:[#allocation29_spill]] %s2731_s22  ;;  %p72_p0 = scmp.ne.s32.totalorder %s2719_s19, %s2715_s18 }
  0x18   : > { %p73_p1 = scmp.eq.s32.totalorder %s2859_s24, 0  ;;  %p2075_p2 = scmp.ge.s32.totalorder %s2735_s23, 1 }
  0x19   : > { %p434_p3 = scmp.lt.s32.totalorder %s2735_s23, 3  ;;  %s3711_s5 = sld [smem:[#allocation63_spill]] }
  0x1a   : > { %p2867_p4 = por %p73_p1, %p72_p0  ;;  %s2737_s30 = smov [#allocation13]  }
  0x1b   : > { %p2874_p5 = pnand %p2075_p2, %p434_p3  ;;  %s455_s16 = sshll.u32 %s2737_s30, 4  ;;  %s456_s16 = int_to_ptr.vmem [resolvable:$true] %s455_s16 }
  0x1c   : > { %s3713_s6 = sld [smem:[#allocation64_spill]]  ;;  %s2738_s14 = smov [#allocation14]  }
  0x1d   : > { %p2196_p6 = pneg %p2874_p5  ;;  %s3715_s9 = sld [smem:[#allocation65_spill]] }
  0x1e   : > { %s467_s17 = sshll.u32 %s2738_s14, 4  ;;  %s2739_s18 = smov [#allocation17]   ;;  %s468_s17 = int_to_ptr.vmem [resolvable:$true] %s467_s17 }
  0x1f   : > { %s453_s28 = sshll.u32 %s3711_s5, 4  ;;  %p2885_p7 = pnand %p2196_p6, %p73_p1  ;;  %s454_s28 = int_to_ptr.hbm [resolvable:$true] %s453_s28 }
  0x20   : > { %s47_s27 = sadd.s32 1, %s2731_s22  ;;  %s59_s14 = sadd.s32 1, %s2723_s20 }
  0x21   : > { %2199 = dma.hbm_to_vmem [thread:$0]  (!%p2885_p7), %s454_s28, 16, %s456_s16, [#allocation12]  }
  0x22   : > { %s465_s15 = sshll.u32 %s3713_s6, 4  ;;  %s496_s6 = sshll.u32 %s2739_s18, 4  ;;  %s466_s15 = int_to_ptr.hbm [resolvable:$true] %s465_s15  ;;  %s497_s6 = int_to_ptr.vmem [resolvable:$true] %s496_s6 }
  0x23   : > { %s494_s5 = sshll.u32 %s3715_s9, 4  ;;  %p48_p8 = scmp.ge.s32.totalorder %s47_s27, 2  ;;  %s495_s5 = int_to_ptr.hbm [resolvable:$true] %s494_s5 }
  0x24   : > { %2202 = dma.hbm_to_vmem [thread:$0]  (!%p2885_p7), %s466_s15, 16, %s468_s17, [#allocation15]  }
  0x25   : > { %2208 = dma.hbm_to_vmem [thread:$0]  (!%p2885_p7), %s495_s5, 64, %s497_s6, [#allocation18]  }
  0x26   : > { %p66_p9 = scmp.ne.s32.totalorder %s2723_s20, %s2719_s19  ;;  %p67_p10 = scmp.eq.s32.totalorder %s2735_s23, 0 }
  0x27   : > { %s3798_s27 = smov (%p48_p8, %s47_s27), 0  ;;  %p2230_p12 = scmp.lt.s32.totalorder %s2735_s23, 2 }
  0x28   : > { %3716 = sst [smem:[#allocation30_spill]] %s3798_s27  ;;  %p68_p11 = por %p67_p10, %p66_p9 }
  0x29   : > { %s54_s15 = ssub.s32 %s2731_s22, %s3798_s27  ;;  %s3660_s28 = sand.u32 1, %s2723_s20  }
  0x2a   : > { %p57_p13 = scmp.eq.s32.totalorder %s54_s15, 0  ;;  %s2911_s16 = sshll.u32 %s3660_s28, 5 }
  0x2b   : > { %s2914_s5 = sshll.u32 %s2731_s22, 5  ;;  %p2916_p0 = pnand %p2230_p12, %p68_p11 }
  0x2c   : > { %s2921_s30 = scalar_select %p57_p13, %s2723_s20, %s59_s14  }
  0x2d   : > { %s3663_s17 = sand.u32 1, %s2735_s23   ;;  %s3719_s1 = sld [smem:[#allocation61_spill]] }
  0x2e   : > { %3718 = sst [smem:[#allocation31_spill]] %s2921_s30  ;;  %s557_s15 = scalar_lea.vmem [#allocation8], %s2911_s16 }
  0x2f   : > { %s566_s13 = sshll.u32 %s557_s15, 4  ;;  %s2931_s22 = scalar_lea.sflag [#allocation9], %s3663_s17  ;;  %s567_s13 = int_to_ptr.vmem [resolvable:$true] %s566_s13 }
  0x30   : > { %s3664_s12 = smov 128   ;;  %s2741_s11 = smov 8  }
  0x31   : > { %s479_s18 = sshll.u32 %s3651_s8, 4  ;;  %s505_s30 = sshll.u32 %s3653_s10, 4  ;;  %s480_s18 = int_to_ptr.hbm [resolvable:$true] %s479_s18  ;;  %s506_s30 = int_to_ptr.hbm [resolvable:$true] %s505_s30 }
  0x32   : > { %s2743_s21 = smov 384   ;;  %s2744_s4 = smov 24  }
  0x33   : > { %s563_s27 = scalar_lea.hbm %s3719_s1, %s2914_s5  ;;  %s2746_s14 = smov 512  }
  0x34   : > { %s564_s28 = sshll.u32 %s563_s27, 4  ;;  %s2742_s27 = smov [#allocation16]   ;;  %s565_s28 = int_to_ptr.hbm [resolvable:$true] %s564_s28 }
  0x35   : > { %2218 = dma.hbm_to_vmem [thread:$0]  (!%p2916_p0), %s565_s28, 512, %s567_s13, %s2931_s22, %s3664_s12, %s3664_s12, %s2741_s11  }
  0x36   : > { %s481_s15 = sshll.u32 %s2742_s27, 4  ;;  %s2745_s13 = smov [#allocation19]   ;;  %s482_s15 = int_to_ptr.vmem [resolvable:$true] %s481_s15 }
  0x37   : > { %2205 = dma.hbm_to_vmem [thread:$0]  (!%p2885_p7), %s480_s18, 768, %s482_s15, [#allocation15], %s2743_s21, %s2743_s21, %s2744_s4  }
  0x38   : > { %s507_s28 = sshll.u32 %s2745_s13, 4  ;;  %s2747_s9 = smov 32   ;;  %s508_s28 = int_to_ptr.vmem [resolvable:$true] %s507_s28 }
  0x39   : > { %2211 = dma.hbm_to_vmem [thread:$0]  (!%p2885_p7), %s506_s30, 8192, %s508_s28, [#allocation18], %s2746_s14, %s2746_s14, %s2747_s9  }
  0x3a   : > { %s540_s27 = scalar_lea.hbm %s3643_s0, %s2914_s5  ;;  %s534_s12 = scalar_lea.vmem [#allocation5], %s2911_s16 }
  0x3b   : > { %s543_s4 = sshll.u32 %s534_s12, 4  ;;  %s541_s21 = sshll.u32 %s540_s27, 4  ;;  %s544_s4 = int_to_ptr.vmem [resolvable:$true] %s543_s4  ;;  %s542_s21 = int_to_ptr.hbm [resolvable:$true] %s541_s21 }
  0x3c   : > { %s3720_s18 = sand.u32 1, %s2723_s20   ;;  %s3721_s26 = smov 128  }
  0x3d   : > { %s531_s15 = scalar_lea.sflag [#allocation6], %s3720_s18  ;;  %s586_s28 = scalar_lea.hbm %s3645_s2, %s2914_s5 }
  0x3e   : > { %2215 = dma.hbm_to_vmem [thread:$0]  (!%p2916_p0), %s542_s21, 512, %s544_s4, %s531_s15, %s3721_s26, %s3721_s26, %s2741_s11  }
  0x3f   : > { %s580_s14 = scalar_lea.vmem [#allocation10], %s2911_s16  ;;  %s587_s1 = sshll.u32 %s586_s28, 4  ;;  %s588_s1 = int_to_ptr.hbm [resolvable:$true] %s587_s1 }
  0x40   : > { %s589_s9 = sshll.u32 %s580_s14, 4  ;;  %s609_s27 = scalar_lea.hbm %s3646_s3, %s2914_s5  ;;  %s590_s9 = int_to_ptr.vmem [resolvable:$true] %s589_s9 }
  0x41   : > { %2221 = dma.hbm_to_vmem [thread:$0]  (!%p2916_p0), %s588_s1, 512, %s590_s9, %s2931_s22, %s3721_s26, %s3721_s26, %s2741_s11  }
  0x42   : > { %s603_s18 = scalar_lea.vmem [#allocation11], %s2911_s16  ;;  %s610_s21 = sshll.u32 %s609_s27, 4  ;;  %s611_s21 = int_to_ptr.hbm [resolvable:$true] %s610_s21 }
  0x43   : > { %s612_s4 = sshll.u32 %s603_s18, 4  ;;  %s3722_s15 = sand.u32 1, %s2735_s23   ;;  %s613_s4 = int_to_ptr.vmem [resolvable:$true] %s612_s4 }
  0x44   : > { %s600_s30 = scalar_lea.sflag [#allocation12], %s3722_s15  ;;  %624 = sbr.rel (%p2874_p5) target bundleno = 1468 (0x5bc), region = 76 }
  0x45   : > { %2224 = dma.hbm_to_vmem [thread:$0]  (!%p2916_p0), %s611_s21, 512, %s613_s4, %s600_s30, %s3721_s26, %s3721_s26, %s2741_s11  }
  0x49   : > { %s626_s22 = sand.u32 1, %s2719_s19  }
  0x4a   : > { %s2096_s13 = sshll.u32 %s626_s22, 5  ;;  %s627_s5 = scalar_lea.sflag [#allocation6], %s626_s22 }
  0x4b   : > { %s2987_s16 = scalar_lea.vmem [#allocation5], %s2096_s13 }
  0x4c   : > { %2686 = dma.done.wait (%p2867_p4), %s627_s5, 512  }
  0x4d   : > { %2688 = vsyncadd (%p2867_p4), %s627_s5, 4294966784  ;;  %s636_s6 = sand.u32 1, %s2859_s24   ;;  %s2994_s11 = scalar_lea.vmem [#allocation8], %s2096_s13 }
  0x4e   : > { %s637_s28 = scalar_lea.sflag [#allocation9], %s636_s6 }
  0x4f   : > { %2690 = dma.done.wait (%p2867_p4), %s637_s28, 1024  }
  0x50   : > { %2692 = vsyncadd (%p2867_p4), %s637_s28, 4294966272  ;;  %s3000_s29 = scalar_lea.vmem [#allocation10], %s2096_s13  ;;  %s657_s26 = scalar_lea.sflag [#allocation12], %s636_s6 }
  0x51   : > { %s3002_s14 = scalar_lea.vmem [#allocation11], %s2096_s13 }
  0x52   : > { %2694 = dma.done.wait (%p2867_p4), %s657_s26, 512  }
  0x53   : > { %2696 = vsyncadd (%p2867_p4), %s657_s26, 4294966784 }
  0x54   : > { %2698 = dma.done.wait (%p73_p1), [#allocation12], 16  }
  0x55   : > { %2700 = vsyncadd (%p73_p1), [#allocation12], 4294967280 }
  0x56   : > { %2702 = dma.done.wait (%p73_p1), [#allocation15], 784  }
  0x57   : > { %2704 = vsyncadd (%p73_p1), [#allocation15], 4294966512 }
  0x58   : > { %2706 = dma.done.wait (%p73_p1), [#allocation18], 8256  }
  0x59   : > { %2708 = vsyncadd (%p73_p1), [#allocation18], 4294959040  ;;  %v856_v0 = vld [vmem:[%s3650_s7 + $0x60] sm:$0xff]  ;;  %v857_v1 = vld [vmem:[%s3650_s7 + $0x68] sm:$0xff]  ;;  %vm870_vm0 = vcmask 261120   ;;  %s3723_s26 = sld [smem:[#allocation62_spill]] }
  0x5a   : > { %v852_v2 = vld [vmem:[%s3650_s7 + $0x40] sm:$0xff]  ;;  %895 = vmatpush.msra.mxu0 %v856_v0  ;;  %2152 = vmatpush.msra.mxu3 %v856_v0  ;;  %v853_v3 = vld [vmem:[%s3650_s7 + $0x48] sm:$0xff]  ;;  %v3035_v4 = vld [vmem:[%s3650_s7 + $0x70] sm:$0xff]  ;;  %vm1005_vm1 = vcmask 130048  }
  0x5b   : > { %2156 = vmatpush.msra.mxu1 %v857_v1  ;;  %2160 = vmatpush.msra.mxu2 %v3035_v4  ;;  %v848_v5 = vld [vmem:[%s3650_s7 + $0x20] sm:$0xff]  ;;  %v849_v6 = vld [vmem:[%s3650_s7 + $0x28] sm:$0xff]  ;;  %v3047_v7 = vld [vmem:[%s3650_s7 + $0x50] sm:$0xff] }
  0x5c   : > { %896 = vmatpush.msra.mxu0 %v852_v2  ;;  %2153 = vmatpush.msra.mxu3 %v852_v2  ;;  %v844_v8 = vld [vmem:[%s3650_s7] sm:$0xff]  ;;  %v3055_v9 = vld [vmem:[%s3650_s7 + $0x30] sm:$0xff]  ;;  %v3058_v10 = vld [vmem:[%s3002_s14] sm:$0xff] }
  0x5d   : > { %2157 = vmatpush.msra.mxu1 %v853_v3  ;;  %2161 = vmatpush.msra.mxu2 %v3047_v7  ;;  %v2299_v11 = vld [vmem:[#allocation13] ss:$0 sm:$0xff]  ;;  %v2300_v13 = vld [vmem:[#allocation14] ss:$0 sm:$0xff]  ;;  %v3065_v14 = vld [vmem:[%s3002_s14 + $0x8] sm:$0xff] }
  0x5e   : > { %897 = vmatpush.msra.mxu0 %v848_v5  ;;  %2154 = vmatpush.msra.mxu3 %v848_v5  ;;  %v845_v12 = vld [vmem:[%s3650_s7 + $0x8] sm:$0xff]  ;;  %v775_v15 = vmul.f32 %v2299_v11, %v3058_v10  ;;  %v776_v16 = vmul.f32 %v2299_v11, %v3065_v14  ;;  %v859_v17 = vld [vmem:[%s3650_s7 + $0x78] sm:$0xff]  ;;  %v846_v21 = vld [vmem:[%s3650_s7 + $0x10] sm:$0xff] }
  0x5f   : > { %2158 = vmatpush.msra.mxu1 %v849_v6  ;;  %2162 = vmatpush.msra.mxu2 %v3055_v9  ;;  %v3074_v18 = vld [vmem:[%s3002_s14 + $0x10] sm:$0xff]  ;;  %v1003_v23 = vld [vmem:[#allocation16 + $0x20] sm:$0xff]  ;;  %v3083_v24 = vld [vmem:[%s3002_s14 + $0x18] sm:$0xff] }
  0x60   : > { %898 = vmatpush.msra.mxu0 %v844_v8  ;;  %2155 = vmatpush.msra.mxu3 %v844_v8  ;;  %v783_v19 = vadd.f32 %v2300_v13, %v775_v15  ;;  %v784_v20 = vadd.f32 %v2300_v13, %v776_v16  ;;  %v777_v22 = vmul.f32 %v2299_v11, %v3074_v18  ;;  %v1004_v28 = vld [vmem:[#allocation16 + $0x28] sm:$0xff]  ;;  %v1001_v36 = vld [vmem:[#allocation16 + $0x10] sm:$0xff]  ;;  %v803_v45 = vld [vmem:[%s3000_s29] sm:$0xff] }
  0x61   : > { %2159 = vmatpush.msra.mxu1 %v845_v12  ;;  %2105 = vmatmul.msk.f32.vlgmr.msra.gmra.mxu0 %vm870_vm0, %v3058_v10  ;;  %v778_v25 = vmul.f32 %v2299_v11, %v3083_v24  ;;  %v855_v29 = vld [vmem:[%s3650_s7 + $0x58] sm:$0xff]  ;;  %v767_v47 = vld [vmem:[%s2994_s11] sm:$0xff]  ;;  %v815_v48 = vld [vmem:[%s3723_s26] sm:$0xff] }
  0x62   : > { %2106 = vmatmul.msk.f32.vlgmr.msra.gmra.mxu3 %vm870_vm0, %v3065_v14  ;;  %2110 = vmatmul.msk.f32.vlgmr.msra.gmra.mxu1 %vm870_vm0, %v3065_v14  ;;  %v787_v26 = vmax.f32 %v783_v19, 0.0  ;;  %v788_v27 = vmax.f32 %v784_v20, 0.0  ;;  %v785_v30 = vadd.f32 %v2300_v13, %v777_v22  ;;  %v1000_v31 = vld [vmem:[#allocation16 + $0x8] sm:$0xff]  ;;  %v1002_v51 = vld [vmem:[#allocation16 + $0x18] sm:$0xff]  ;;  %v999_v57 = vld [vmem:[#allocation16] sm:$0xff]  ;;  %v832_v59 = vsub.f32 1.0, %v767_v47 }
  0x63   : > { %982 = vmatpush.msrb.mxu3 %v859_v17  ;;  %924 = vmatpush.msrb.mxu0 %v857_v1  ;;  %v851_v35 = vld [vmem:[%s3650_s7 + $0x38] sm:$0xff]  ;;  %v786_v37 = vadd.f32 %v2300_v13, %v778_v25  ;;  %v804_v49 = vld [vmem:[%s3000_s29 + $0x8] sm:$0xff]  ;;  %v824_v55 = vld [vmem:[%s2987_s16] sm:$0xff] }
  0x64   : > { %2163 = vmatpush.msra.mxu2 %v846_v21  ;;  %1061 = vmatpush.msrb.mxu1 %v1003_v23  ;;  %v791_v32 = vsub.f32 0.0, %v787_v26  ;;  %v792_v33 = vsub.f32 0.0, %v788_v27  ;;  %v789_v34 = vmax.f32 %v785_v30, 0.0  ;;  %v847_v43 = vld [vmem:[%s3650_s7 + $0x18] sm:$0xff]  ;;  %v768_v62 = vld [vmem:[%s2994_s11 + $0x8] sm:$0xff]  ;;  %v828_v1 = vmul.f32 %v824_v55, %v767_v47  ;;  %v806_v23 = vld [vmem:[%s3000_s29 + $0x18] sm:$0xff] }
  0x65   : > { %2114 = vmatmul.msk.f32.vlgmr.msra.gmra.mxu2 %vm870_vm0, %v3065_v14  ;;  %925 = vmatpush.msrb.mxu0 %v853_v3  ;;  %v790_v42 = vmax.f32 %v786_v37, 0.0  ;;  %v833_v5 = vsub.f32 1.0, %v768_v62  ;;  %v769_v16 = vld [vmem:[%s2994_s11 + $0x10] sm:$0xff] }
  0x66   : > { %1090 = vmatpush.msrb.mxu2 %v1004_v28  ;;  %983 = vmatpush.msrb.mxu3 %v855_v29  ;;  %v795_v38 = vmul.f32 1.442695, %v791_v32  ;;  %v797_v39 = vmul.f32 1.442695, %v792_v33  ;;  %v793_v40 = vsub.f32 0.0, %v789_v34  ;;  %v826_v20 = vld [vmem:[%s2987_s16 + $0x10] sm:$0xff] }
  0x67   : > { %926 = vmatpush.msrb.mxu0 %v849_v6  ;;  %1062 = vmatpush.msrb.mxu1 %v1000_v31  ;;  %v794_v44 = vsub.f32 0.0, %v790_v42  ;;  %v770_v28 = vld [vmem:[%s2994_s11 + $0x18] sm:$0xff] }
  0x68   : > { %984 = vmatpush.msrb.mxu3 %v851_v35  ;;  %1091 = vmatpush.msrb.mxu2 %v1001_v36  ;;  %2301 = vpow2.f32 %v795_v38  ;;  %v799_v41 = vmul.f32 1.442695, %v793_v40  ;;  %v835_v31 = vsub.f32 1.0, %v770_v28  ;;  %v827_v32 = vld [vmem:[%s2987_s16 + $0x18] sm:$0xff]  ;;  %v860_v35 = vld [vmem:[#allocation17] sm:$0xf] }
  0x69   : > { %927 = vmatpush.msrb.mxu0 %v845_v12  ;;  %2303 = vpow2.f32 %v797_v39  ;;  %v801_v54 = vmul.f32 1.442695, %v794_v44 }
  0x6a   : > { %2107 = vmatmul.msk.f32.gmra.mxu3 %vm870_vm0, %v3074_v18  ;;  %2109 = vmatmul.msk.f32.vlgmr.msrb.gmra.mxu0 %vm870_vm0, %v3058_v10  ;;  %2305 = vpow2.f32 %v799_v41 }
  0x6b   : > { %2111 = vmatmul.msk.f32.gmra.mxu1 %vm870_vm0, %v3074_v18  ;;  %953 = vmatpush.msra.mxu0 %v3035_v4  ;;  %2307 = vpow2.f32 %v801_v54  ;;  %v825_v4 = vld [vmem:[%s2987_s16 + $0x8] sm:$0xff]  ;;  %s3724_s16 = sld [smem:[#allocation28_spill]] }
  0x6c   : > { %985 = vmatpush.msrb.mxu3 %v847_v43 }
  0x6d   : > { %2115 = vmatmul.msk.f32.gmra.mxu2 %vm870_vm0, %v3074_v18  ;;  %954 = vmatpush.msra.mxu0 %v3047_v7  ;;  %v805_v7 = vld [vmem:[%s3000_s29 + $0x10] sm:$0xff] }
  0x6e   : > { %v2302_v46 = vpop.eup %2301 }
  0x6f   : > { %955 = vmatpush.msra.mxu0 %v3055_v9  ;;  %v2304_v50 = vpop.eup %2303  ;;  %v807_v52 = vmul.f32 %v2302_v46, %v803_v45  ;;  %v811_v53 = vsub.f32 1.0, %v2302_v46  ;;  %v829_v9 = vmul.f32 %v825_v4, %v768_v62 }
  0x70   : > { %v812_v56 = vsub.f32 1.0, %v2304_v50  ;;  %v808_v60 = vmul.f32 %v2304_v50, %v804_v49  ;;  %v2306_v61 = vpop.eup %2305 }
  0x71   : > { %956 = vmatpush.msra.mxu0 %v846_v21  ;;  %v816_v58 = vmul.f32 %v815_v48, %v811_v53  ;;  %v813_v6 = vsub.f32 1.0, %v2306_v61  ;;  %v809_v12 = vmul.f32 %v2306_v61, %v805_v7  ;;  %v2308_v15 = vpop.eup %2307  ;;  %v834_v21 = vsub.f32 1.0, %v769_v16  ;;  %p2133_p1 = scmp.ne.s32.totalorder %s3724_s16, 0 }
  0x72   : > { %2108 = vmatmul.msk.f32.gmra.mxu3 %vm870_vm0, %v3083_v24  ;;  %2113 = vmatmul.msk.f32.vlgmr.msra.gmra.mxu0 %vm870_vm0, %v3058_v10  ;;  %v817_v63 = vmul.f32 %v815_v48, %v812_v56  ;;  %v814_v22 = vsub.f32 1.0, %v2308_v15  ;;  %v810_v26 = vmul.f32 %v2308_v15, %v806_v23 }
  0x73   : > { %2112 = vmatmul.msk.f32.gmra.mxu1 %vm870_vm0, %v3083_v24  ;;  %1032 = vmatpush.msrb.mxu0 %v1002_v51  ;;  %v820_v0 = vadd.f32 %v816_v58, %v807_v52  ;;  %v818_v13 = vmul.f32 %v815_v48, %v813_v6 }
  0x74   : > { %v821_v3 = vadd.f32 %v817_v63, %v808_v60  ;;  %v819_v27 = vmul.f32 %v815_v48, %v814_v22 }
  0x75   : > { %2116 = vmatmul.msk.f32.gmra.mxu2 %vm870_vm0, %v3083_v24  ;;  %1033 = vmatpush.msrb.mxu0 %v999_v57  ;;  %v836_v2 = vmul.f32 %v832_v59, %v820_v0  ;;  %v822_v19 = vadd.f32 %v818_v13, %v809_v12  ;;  %v864_v57 = vperm.slane %v860_v35, 2  ;;  %v863_v59 = vperm.slane %v860_v35, 1 }
  0x76   : > { %v837_v11 = vmul.f32 %v833_v5, %v821_v3  ;;  %v823_v30 = vadd.f32 %v819_v27, %v810_v26 }
  0x77   : > { %v840_v8 = vadd.f32 %v836_v2, %v828_v1  ;;  %v838_v25 = vmul.f32 %v834_v21, %v822_v19 }
  0x78   : > { %v841_v17 = vadd.f32 %v837_v11, %v829_v9  ;;  %v839_v33 = vmul.f32 %v835_v31, %v823_v30 }
  0x7a   : > { %2117 = vmatmul.msk.f32.vlgmr.msrb.gmra.mxu3 %vm870_vm0, %v3058_v10  ;;  %2121 = vmatmul.msk.f32.vlgmr.msrb.gmra.mxu0 %vm1005_vm1, %v840_v8  ;;  %v830_v10 = vmul.f32 %v826_v20, %v769_v16 }
  0x7b   : > { %2125 = vmatmul.msk.f32.vlgmr.msrb.gmra.mxu1 %vm1005_vm1, %v840_v8 }
  0x7c   : > { %v842_v29 = vadd.f32 %v838_v25, %v830_v10 }
  0x7d   : > { %2129 = vmatmul.msk.f32.vlgmr.msrb.gmra.mxu2 %vm1005_vm1, %v840_v8  ;;  %v865_v8 = vperm.slane %v860_v35, 3 }
  0x82   : > { %2118 = vmatmul.msk.f32.gmra.mxu3 %vm870_vm0, %v3065_v14  ;;  %2122 = vmatmul.msk.f32.gmra.mxu0 %vm1005_vm1, %v841_v17  ;;  %v831_v14 = vmul.f32 %v827_v32, %v770_v28 }
  0x83   : > { %2126 = vmatmul.msk.f32.gmra.mxu1 %vm1005_vm1, %v841_v17 }
  0x84   : > { %v843_v34 = vadd.f32 %v839_v33, %v831_v14 }
  0x85   : > { %2130 = vmatmul.msk.f32.gmra.mxu2 %vm1005_vm1, %v841_v17 }
  0x8a   : > { %2119 = vmatmul.msk.f32.gmra.mxu3 %vm870_vm0, %v3074_v18  ;;  %2123 = vmatmul.msk.f32.gmra.mxu0 %vm1005_vm1, %v842_v29  ;;  %v862_v18 = vperm.slane %v860_v35, 0 }
  0x8b   : > { %2127 = vmatmul.msk.f32.gmra.mxu1 %vm1005_vm1, %v842_v29 }
  0x8d   : > { %2131 = vmatmul.msk.f32.gmra.mxu2 %vm1005_vm1, %v842_v29 }
  0x92   : > { %2120 = vmatmul.msk.f32.gmra.mxu3 %vm870_vm0, %v3083_v24  ;;  %2124 = vmatmul.msk.f32.gmra.mxu0 %vm1005_vm1, %v843_v34 }
  0x93   : > { %2128 = vmatmul.msk.f32.gmra.mxu1 %vm1005_vm1, %v843_v34 }
  0x95   : > { %2132 = vmatmul.msk.f32.gmra.mxu2 %vm1005_vm1, %v843_v34 }
  0xde   : > { %v900_v36 = vpop.f32.mrf.mxu0 }
  0xdf   : > { %v901_v37 = vadd.f32 %v900_v36, %v862_v18  ;;  %v932_v38 = vpop.f32.mrf.mxu1 }
  0xe0   : > { %v933_v13 = vadd.f32 %v932_v38, %v863_v59 }
  0xe1   : > { %v1105_v39 = vmax.f32 %v901_v37, 0.0 }
  0xe3   : > { %v1109_v40 = vsub.f32 0.0, %v1105_v39 }
  0xe5   : > { %v1113_v41 = vmul.f32 1.442695, %v1109_v40  ;;  %v903_v42 = vpop.f32.mrf.mxu3 }
  0xe6   : > { %v904_v43 = vadd.f32 %v903_v42, %v862_v18 }
  0xe7   : > { %2309 = vpow2.f32 %v1113_v41  ;;  %v929_v44 = vpop.f32.mrf.mxu0 }
  0xe8   : > { %v1106_v45 = vmax.f32 %v904_v43, 0.0  ;;  %v935_v24 = vpop.f32.mrf.mxu1  ;;  %v961_v46 = vpop.f32.mrf.mxu2  ;;  %v930_v63 = vadd.f32 %v929_v44, %v863_v59 }
  0xe9   : > { %v962_v16 = vadd.f32 %v961_v46, %v864_v57  ;;  %v936_v26 = vadd.f32 %v935_v24, %v863_v59 }
  0xea   : > { %v1110_v47 = vsub.f32 0.0, %v1106_v45 }
  0xec   : > { %v1115_v48 = vmul.f32 1.442695, %v1110_v47 }
  0xed   : > { %v2310_v49 = vpop.eup %2309  ;;  %v906_v50 = vpop.f32.mrf.mxu3 }
  0xee   : > { %1121 = vst [vmem:[#allocation2 + $0x10] sm:$0xff] %v2310_v49  ;;  %2311 = vpow2.f32 %v1115_v48  ;;  %v907_v51 = vadd.f32 %v906_v50, %v862_v18 }
  0xef   : > { %v958_v52 = vpop.f32.mrf.mxu0 }
  0xf0   : > { %v1107_v53 = vmax.f32 %v907_v51, 0.0  ;;  %v938_v54 = vpop.f32.mrf.mxu1  ;;  %v964_v55 = vpop.f32.mrf.mxu2  ;;  %v959_v61 = vadd.f32 %v958_v52, %v864_v57 }
  0xf1   : > { %v965_v28 = vadd.f32 %v964_v55, %v864_v57  ;;  %v939_v35 = vadd.f32 %v938_v54, %v863_v59 }
  0xf2   : > { %v1111_v56 = vsub.f32 0.0, %v1107_v53 }
  0xf4   : > { %v2312_v58 = vpop.eup %2311  ;;  %v1117_v60 = vmul.f32 1.442695, %v1111_v56 }
  0xf5   : > { %1122 = vst [vmem:[#allocation2] sm:$0xff] %v2312_v58  ;;  %v909_v62 = vpop.f32.mrf.mxu3 }
  0xf6   : > { %2313 = vpow2.f32 %v1117_v60  ;;  %v910_v0 = vadd.f32 %v909_v62, %v862_v18 }
  0xf7   : > { %v1035_v1 = vpop.f32.mrf.mxu0 }
  0xf8   : > { %v1108_v2 = vmax.f32 %v910_v0, 0.0  ;;  %v967_v3 = vpop.f32.mrf.mxu2  ;;  %v1125_v4 = vadd.f32 %v1035_v1, %v930_v63  ;;  %v1064_v5 = vpop.f32.mrf.mxu1 }
  0xf9   : > { %v1126_v6 = vadd.f32 %v1064_v5, %v959_v61  ;;  %v968_v36 = vadd.f32 %v967_v3, %v864_v57 }
  0xfa   : > { %v1112_v7 = vsub.f32 0.0, %v1108_v2  ;;  %1137 = vst [vmem:[#allocation3] sm:$0xff] %v1125_v4 }
  0xfb   : > { %1138 = vst [vmem:[#allocation3 + $0x38] sm:$0xff] %v1126_v6 }
  0xfc   : > { %v2314_v9 = vpop.eup %2313  ;;  %v1119_v11 = vmul.f32 1.442695, %v1112_v7 }
  0xfd   : > { %1123 = vst [vmem:[#allocation2 + $0x18] sm:$0xff] %v2314_v9  ;;  %v987_v12 = vpop.f32.mrf.mxu3 }
  0xfe   : > { %2315 = vpow2.f32 %v1119_v11  ;;  %v988_v15 = vadd.f32 %v987_v12, %v865_v8 }
  0xff   : > { %v1038_v17 = vpop.f32.mrf.mxu0 }
 0x100   : > { %v1128_v19 = vadd.f32 %v1038_v17, %v933_v13  ;;  %v1067_v20 = vpop.f32.mrf.mxu1  ;;  %v1093_v21 = vpop.f32.mrf.mxu2 }
 0x101   : > { %v1129_v22 = vadd.f32 %v1067_v20, %v962_v16  ;;  %v1127_v23 = vadd.f32 %v1093_v21, %v988_v15 }
 0x102   : > { %1140 = vst [vmem:[#allocation3 + $0x18] sm:$0xff] %v1128_v19 }
 0x103   : > { %1141 = vst [vmem:[#allocation3 + $0x30] sm:$0xff] %v1129_v22 }
 0x104   : > { %v2316_v10 = vpop.eup %2315  ;;  %1139 = vst [vmem:[#allocation3 + $0x50] sm:$0xff] %v1127_v23 }
 0x105   : > { %1124 = vst [vmem:[#allocation2 + $0x8] sm:$0xff] %v2316_v10  ;;  %v990_v25 = vpop.f32.mrf.mxu3 }
 0x106   : > { %v991_v27 = vadd.f32 %v990_v25, %v865_v8 }
 0x107   : > { %v1041_v29 = vpop.f32.mrf.mxu0 }
 0x108   : > { %v1131_v30 = vadd.f32 %v1041_v29, %v936_v26  ;;  %v1070_v31 = vpop.f32.mrf.mxu1  ;;  %v1096_v32 = vpop.f32.mrf.mxu2 }
 0x109   : > { %v1132_v14 = vadd.f32 %v1070_v31, %v965_v28  ;;  %v1130_v33 = vadd.f32 %v1096_v32, %v991_v27 }
 0x10a   : > { %1143 = vst [vmem:[#allocation3 + $0x8] sm:$0xff] %v1131_v30 }
 0x10b   : > { %1144 = vst [vmem:[#allocation3 + $0x40] sm:$0xff] %v1132_v14 }
 0x10c   : > { %1142 = vst [vmem:[#allocation3 + $0x28] sm:$0xff] %v1130_v33 }
 0x10d   : > { %v993_v34 = vpop.f32.mrf.mxu3 }
 0x10e   : > { %v994_v18 = vadd.f32 %v993_v34, %v865_v8 }
 0x10f   : > { %v1044_v37 = vpop.f32.mrf.mxu0 }
 0x110   : > { %v1134_v38 = vadd.f32 %v1044_v37, %v939_v35  ;;  %v1073_v39 = vpop.f32.mrf.mxu1  ;;  %v1099_v40 = vpop.f32.mrf.mxu2 }
 0x111   : > { %v1135_v41 = vadd.f32 %v1073_v39, %v968_v36  ;;  %v1133_v42 = vadd.f32 %v1099_v40, %v994_v18 }
 0x112   : > { %1146 = vst [vmem:[#allocation3 + $0x48] sm:$0xff] %v1134_v38 }
 0x113   : > { %1147 = vst [vmem:[#allocation3 + $0x58] sm:$0xff] %v1135_v41 }
 0x114   : > { %1145 = vst [vmem:[#allocation3 + $0x20] sm:$0xff] %v1133_v42 }
 0x115   : > { %v996_v43 = vpop.f32.mrf.mxu3 }
 0x116   : > { %v997_v44 = vadd.f32 %v996_v43, %v865_v8 }
 0x117   : > { %1152 = sbr.rel (%p2133_p1) target bundleno = 286 (0x11e), region = 116 }
 0x118   : > { %v1102_v45 = vpop.f32.mrf.mxu2 }
 0x119   : > { %v1136_v24 = vadd.f32 %v1102_v45, %v997_v44 }
 0x11b   : > { %1148 = vst [vmem:[#allocation3 + $0x10] sm:$0xff] %v1136_v24 }
 0x11c   : > { %v2748_v46 = vmov 0.0  }
 0x11d   : > { %1153 = vst [vmem:[#allocation4] sm:$0xff] %v2748_v46 }
 0x11e PF: > { %v3156_v47 = vld [vmem:[#allocation19 + $0x1e0] sm:$0xff]  ;;  %v3160_v49 = vld [vmem:[#allocation19 + $0x1e8] sm:$0xff]  ;;  %v3190_v59 = vld [vmem:[#allocation19 + $0x1f8] sm:$0xff]  ;;  %s3755_s25 = sld [smem:[#allocation66_spill]] }
 0x11f   : > { %v3158_v48 = vld [vmem:[#allocation19 + $0x1c0] sm:$0xff]  ;;  %1225 = vmatpush.msra.mxu3 %v3156_v47  ;;  %1245 = vmatpush.msra.mxu0 %v3160_v49  ;;  %v3164_v50 = vld [vmem:[#allocation19 + $0x1c8] sm:$0xff]  ;;  %v3197_v62 = vld [vmem:[#allocation19 + $0x1d8] sm:$0xff]  ;;  %s3786_s9 = sld [smem:[#allocation28_spill]] }
 0x120   : > { %3725 = vst [vmem:[#allocation32_spill] sm:$0xff] %v3164_v50  ;;  %v3166_v51 = vld [vmem:[#allocation19 + $0x1a0] sm:$0xff]  ;;  %v3168_v52 = vld [vmem:[#allocation19 + $0x1a8] sm:$0xff]  ;;  %1285 = vmatpush.msra.mxu2 %v3190_v59  ;;  %v3206_v1 = vld [vmem:[#allocation19 + $0x1b8] sm:$0xff] }
 0x121   : > { %1226 = vmatpush.msra.mxu3 %v3158_v48  ;;  %1246 = vmatpush.msra.mxu0 %v3164_v50  ;;  %v3172_v53 = vld [vmem:[#allocation19 + $0x180] sm:$0xff]  ;;  %v3174_v54 = vld [vmem:[#allocation19 + $0x188] sm:$0xff]  ;;  %v3208_v2 = vld [vmem:[#allocation19 + $0x1f0] sm:$0xff] }
 0x122   : > { %v3178_v55 = vld [vmem:[#allocation19 + $0x160] sm:$0xff]  ;;  %v3180_v56 = vld [vmem:[#allocation19 + $0x168] sm:$0xff]  ;;  %1286 = vmatpush.msra.mxu2 %v3197_v62  ;;  %v3212_v3 = vld [vmem:[#allocation19 + $0x198] sm:$0xff]  ;;  %1265 = vmatpush.msra.mxu1 %v3208_v2 }
 0x123   : > { %1227 = vmatpush.msra.mxu3 %v3166_v51  ;;  %1247 = vmatpush.msra.mxu0 %v3168_v52  ;;  %v3184_v57 = vld [vmem:[#allocation19 + $0x140] sm:$0xff]  ;;  %v3186_v58 = vld [vmem:[#allocation19 + $0x148] sm:$0xff]  ;;  %v3214_v4 = vld [vmem:[#allocation19 + $0x1d0] sm:$0xff] }
 0x124   : > { %v3192_v60 = vld [vmem:[#allocation19 + $0x120] sm:$0xff]  ;;  %v3194_v61 = vld [vmem:[#allocation19 + $0x128] sm:$0xff]  ;;  %1287 = vmatpush.msra.mxu2 %v3206_v1  ;;  %v3224_v7 = vld [vmem:[#allocation19 + $0x178] sm:$0xff]  ;;  %1266 = vmatpush.msra.mxu1 %v3214_v4 }
 0x125   : > { %1228 = vmatpush.msra.mxu3 %v3172_v53  ;;  %1248 = vmatpush.msra.mxu0 %v3174_v54  ;;  %v3201_v63 = vld [vmem:[#allocation19 + $0x100] sm:$0xff]  ;;  %v3203_v0 = vld [vmem:[#allocation19 + $0x108] sm:$0xff]  ;;  %v3226_v8 = vld [vmem:[#allocation19 + $0x1b0] sm:$0xff]  ;;  %p2142_p2 = scmp.ne.s32.totalorder %s3786_s9, 1 }
 0x126   : > { %v3216_v5 = vld [vmem:[#allocation19 + $0xe0] sm:$0xff]  ;;  %v3218_v6 = vld [vmem:[#allocation19 + $0xe8] sm:$0xff]  ;;  %1288 = vmatpush.msra.mxu2 %v3212_v3  ;;  %v3236_v12 = vld [vmem:[#allocation19 + $0x158] sm:$0xff]  ;;  %1267 = vmatpush.msra.mxu1 %v3226_v8  ;;  %s3787_s17 = sld [smem:[#allocation67_spill]] (!%p2142_p2) }
 0x127   : > { %1229 = vmatpush.msra.mxu3 %v3178_v55  ;;  %1249 = vmatpush.msra.mxu0 %v3180_v56  ;;  %v3228_v9 = vld [vmem:[#allocation19 + $0xc0] sm:$0xff]  ;;  %v3230_v11 = vld [vmem:[#allocation19 + $0xc8] sm:$0xff]  ;;  %v3238_v13 = vld [vmem:[#allocation19 + $0x190] sm:$0xff]  ;;  %s3788_s26 = sld [smem:[#allocation68_spill]] (!%p2142_p2) }
 0x128   : > { %3726 = vst [vmem:[#allocation33_spill] sm:$0xff] %v3230_v11  ;;  %v3240_v15 = vld [vmem:[#allocation19 + $0xa0] sm:$0xff]  ;;  %v3242_v16 = vld [vmem:[#allocation19 + $0xa8] sm:$0xff]  ;;  %1289 = vmatpush.msra.mxu2 %v3224_v7  ;;  %v3248_v17 = vld [vmem:[#allocation19 + $0x138] sm:$0xff]  ;;  %1268 = vmatpush.msra.mxu1 %v3238_v13  ;;  %s3789_s29 = sld [smem:[#allocation69_spill]] (!%p2142_p2) }
 0x129   : > { %1230 = vmatpush.msra.mxu3 %v3184_v57  ;;  %1250 = vmatpush.msra.mxu0 %v3186_v58  ;;  %3727 = vst [vmem:[#allocation34_spill] sm:$0xff] %v3240_v15  ;;  %v3250_v19 = vld [vmem:[#allocation19 + $0x170] sm:$0xff]  ;;  %v3252_v20 = vld [vmem:[#allocation19 + $0x80] sm:$0xff]  ;;  %v3254_v21 = vld [vmem:[#allocation19 + $0x88] sm:$0xff] }
 0x12a   : > { %3728 = vst [vmem:[#allocation35_spill] sm:$0xff] %v3242_v16  ;;  %1290 = vmatpush.msra.mxu2 %v3236_v12  ;;  %v3260_v22 = vld [vmem:[#allocation19 + $0x118] sm:$0xff]  ;;  %v3262_v23 = vld [vmem:[#allocation19 + $0x150] sm:$0xff]  ;;  %v3264_v10 = vld [vmem:[#allocation19 + $0x60] sm:$0xff]  ;;  %1269 = vmatpush.msra.mxu1 %v3250_v19 }
 0x12b   : > { %1231 = vmatpush.msra.mxu3 %v3192_v60  ;;  %1251 = vmatpush.msra.mxu0 %v3194_v61  ;;  %3729 = vst [vmem:[#allocation36_spill] sm:$0xff] %v3252_v20  ;;  %v3266_v25 = vld [vmem:[#allocation19 + $0x68] sm:$0xff]  ;;  %v3272_v26 = vld [vmem:[#allocation19 + $0xf8] sm:$0xff]  ;;  %v3274_v27 = vld [vmem:[#allocation19 + $0x130] sm:$0xff] }
 0x12c   : > { %3730 = vst [vmem:[#allocation37_spill] sm:$0xff] %v3254_v21  ;;  %1291 = vmatpush.msra.mxu2 %v3248_v17  ;;  %v3276_v28 = vld [vmem:[#allocation19 + $0x40] sm:$0xff]  ;;  %v3278_v29 = vld [vmem:[#allocation19 + $0x48] sm:$0xff]  ;;  %1270 = vmatpush.msra.mxu1 %v3262_v23  ;;  %v1159_v31 = vld [vmem:[#allocation2 + $0x10] sm:$0xff] }
 0x12d   : > { %1232 = vmatpush.msra.mxu3 %v3201_v63  ;;  %1252 = vmatpush.msra.mxu0 %v3203_v0  ;;  %3731 = vst [vmem:[#allocation38_spill] sm:$0xff] %v3264_v10  ;;  %v1158_v30 = vld [vmem:[#allocation4] sm:$0xff]  ;;  %v3284_v32 = vld [vmem:[#allocation19 + $0xd8] sm:$0xff]  ;;  %v3286_v14 = vld [vmem:[#allocation19 + $0x110] sm:$0xff] }
 0x12e   : > { %3732 = vst [vmem:[#allocation39_spill] sm:$0xff] %v3266_v25  ;;  %1292 = vmatpush.msra.mxu2 %v3260_v22  ;;  %v3288_v33 = vld [vmem:[#allocation19 + $0x20] sm:$0xff]  ;;  %v3290_v34 = vld [vmem:[#allocation19 + $0x28] sm:$0xff]  ;;  %1271 = vmatpush.msra.mxu1 %v3274_v27  ;;  %v3296_v35 = vld [vmem:[#allocation19 + $0xb8] sm:$0xff]  ;;  %v3302_v37 = vmul.f32 %v1159_v31, %v1158_v30 }
 0x12f   : > { %1233 = vmatpush.msra.mxu3 %v3216_v5  ;;  %1253 = vmatpush.msra.mxu0 %v3218_v6  ;;  %3733 = vst [vmem:[#allocation40_spill] sm:$0xff] %v3276_v28  ;;  %v3298_v18 = vld [vmem:[#allocation19 + $0xf0] sm:$0xff]  ;;  %v3300_v36 = vld [vmem:[#allocation19] sm:$0xff]  ;;  %v3304_v38 = vld [vmem:[#allocation19 + $0x8] sm:$0xff] }
 0x130   : > { %3734 = vst [vmem:[#allocation41_spill] sm:$0xff] %v3278_v29  ;;  %1293 = vmatpush.msra.mxu2 %v3272_v26  ;;  %1272 = vmatpush.msra.mxu1 %v3286_v14  ;;  %v3311_v39 = vld [vmem:[#allocation19 + $0x98] sm:$0xff]  ;;  %v3314_v40 = vld [vmem:[#allocation19 + $0xd0] sm:$0xff] }
 0x131   : > { %1234 = vmatpush.msra.mxu3 %v3228_v9  ;;  %1254 = vmatpush.msra.mxu0 %v3230_v11  ;;  %3735 = vst [vmem:[#allocation42_spill] sm:$0xff] %v3284_v32  ;;  %v3320_v41 = vld [vmem:[#allocation19 + $0x78] sm:$0xff]  ;;  %v3322_v42 = vld [vmem:[#allocation19 + $0xb0] sm:$0xff] }
 0x132   : > { %3736 = vst [vmem:[#allocation43_spill] sm:$0xff] %v3288_v33  ;;  %1294 = vmatpush.msra.mxu2 %v3284_v32  ;;  %1273 = vmatpush.msra.mxu1 %v3298_v18  ;;  %v3326_v43 = vld [vmem:[#allocation19 + $0x58] sm:$0xff]  ;;  %v3328_v44 = vld [vmem:[#allocation19 + $0x90] sm:$0xff] }
 0x133   : > { %1235 = vmatpush.msra.mxu3 %v3240_v15  ;;  %1255 = vmatpush.msra.mxu0 %v3242_v16  ;;  %3737 = vst [vmem:[#allocation44_spill] sm:$0xff] %v3290_v34  ;;  %v3334_v45 = vld [vmem:[#allocation19 + $0x38] sm:$0xff]  ;;  %v3336_v24 = vld [vmem:[#allocation19 + $0x70] sm:$0xff] }
 0x134   : > { %3738 = vst [vmem:[#allocation45_spill] sm:$0xff] %v3296_v35  ;;  %1295 = vmatpush.msra.mxu2 %v3296_v35  ;;  %1274 = vmatpush.msra.mxu1 %v3314_v40  ;;  %v3342_v46 = vld [vmem:[#allocation19 + $0x18] sm:$0xff]  ;;  %v3344_v30 = vld [vmem:[#allocation19 + $0x50] sm:$0xff] }
 0x135   : > { %1236 = vmatpush.msra.mxu3 %v3252_v20  ;;  %1256 = vmatpush.msra.mxu0 %v3254_v21  ;;  %3739 = vst [vmem:[#allocation46_spill] sm:$0xff] %v3300_v36  ;;  %v3350_v31 = vld [vmem:[#allocation19 + $0x30] sm:$0xff] }
 0x136   : > { %3740 = vst [vmem:[#allocation47_spill] sm:$0xff] %v3302_v37  ;;  %1296 = vmatpush.msra.mxu2 %v3311_v39  ;;  %1275 = vmatpush.msra.mxu1 %v3322_v42 }
 0x137   : > { %1237 = vmatpush.msra.mxu3 %v3264_v10  ;;  %1257 = vmatpush.msra.mxu0 %v3266_v25  ;;  %3741 = vst [vmem:[#allocation48_spill] sm:$0xff] %v3304_v38 }
 0x138   : > { %3742 = vst [vmem:[#allocation49_spill] sm:$0xff] %v3311_v39  ;;  %1297 = vmatpush.msra.mxu2 %v3320_v41  ;;  %1276 = vmatpush.msra.mxu1 %v3328_v44 }
 0x139   : > { %1238 = vmatpush.msra.mxu3 %v3276_v28  ;;  %1258 = vmatpush.msra.mxu0 %v3278_v29  ;;  %3743 = vst [vmem:[#allocation50_spill] sm:$0xff] %v3314_v40 }
 0x13a   : > { %3744 = vst [vmem:[#allocation51_spill] sm:$0xff] %v3320_v41  ;;  %1298 = vmatpush.msra.mxu2 %v3326_v43  ;;  %1277 = vmatpush.msra.mxu1 %v3336_v24 }
 0x13b   : > { %1239 = vmatpush.msra.mxu3 %v3288_v33  ;;  %1259 = vmatpush.msra.mxu0 %v3290_v34  ;;  %3745 = vst [vmem:[#allocation52_spill] sm:$0xff] %v3322_v42 }
 0x13c   : > { %3746 = vst [vmem:[#allocation53_spill] sm:$0xff] %v3326_v43  ;;  %1299 = vmatpush.msra.mxu2 %v3334_v45  ;;  %1278 = vmatpush.msra.mxu1 %v3344_v30 }
 0x13d   : > { %1240 = vmatpush.msra.mxu3 %v3300_v36  ;;  %1260 = vmatpush.msra.mxu0 %v3304_v38  ;;  %3747 = vst [vmem:[#allocation54_spill] sm:$0xff] %v3328_v44 }
 0x13e   : > { %1241 = vmatmul.f32.vlgmr.msra.gmra.mxu3 %v3302_v37  ;;  %1261 = vmatmul.f32.vlgmr.msra.gmra.mxu0 %v3302_v37  ;;  %3748 = vst [vmem:[#allocation55_spill] sm:$0xff] %v3334_v45 }
 0x13f   : > { %1360 = vmatpush.msrb.mxu3 %v3156_v47  ;;  %1380 = vmatpush.msrb.mxu0 %v3160_v49  ;;  %3749 = vst [vmem:[#allocation56_spill] sm:$0xff] %v3336_v24 }
 0x140   : > { %3750 = vst [vmem:[#allocation57_spill] sm:$0xff] %v3342_v46  ;;  %1300 = vmatpush.msra.mxu2 %v3342_v46  ;;  %1279 = vmatpush.msra.mxu1 %v3350_v31 }
 0x141   : > { %1361 = vmatpush.msrb.mxu3 %v3158_v48  ;;  %1381 = vmatpush.msrb.mxu0 %v3164_v50  ;;  %3751 = vst [vmem:[#allocation58_spill] sm:$0xff] %v3344_v30  ;;  %v3357_v50 = vld [vmem:[#allocation19 + $0x10] sm:$0xff] }
 0x142   : > { %3752 = vst [vmem:[#allocation59_spill] sm:$0xff] %v3350_v31  ;;  %1301 = vmatmul.f32.vlgmr.msra.gmra.mxu2 %v3302_v37  ;;  %1280 = vmatpush.msra.mxu1 %v3357_v50 }
 0x143   : > { %1362 = vmatpush.msrb.mxu3 %v3166_v51  ;;  %1382 = vmatpush.msrb.mxu0 %v3168_v52  ;;  %3753 = vst [vmem:[#allocation60_spill] sm:$0xff] %v3357_v50 }
 0x144   : > { %1420 = vmatpush.msrb.mxu2 %v3190_v59  ;;  %1281 = vmatmul.f32.vlgmr.msra.gmra.mxu1 %v3302_v37  ;;  %v3754_v37 = vld [vmem:[#allocation32_spill] sm:$0xff] }
 0x145   : > { %1363 = vmatpush.msrb.mxu3 %v3172_v53  ;;  %1383 = vmatpush.msrb.mxu0 %v3174_v54 }
 0x146   : > { %1421 = vmatpush.msrb.mxu2 %v3197_v62  ;;  %1400 = vmatpush.msrb.mxu1 %v3208_v2 }
 0x147   : > { %1364 = vmatpush.msrb.mxu3 %v3178_v55  ;;  %1384 = vmatpush.msrb.mxu0 %v3180_v56 }
 0x148   : > { %1422 = vmatpush.msrb.mxu2 %v3206_v1  ;;  %1401 = vmatpush.msrb.mxu1 %v3214_v4 }
 0x149   : > { %1365 = vmatpush.msrb.mxu3 %v3184_v57  ;;  %1385 = vmatpush.msrb.mxu0 %v3186_v58 }
 0x14a   : > { %1423 = vmatpush.msrb.mxu2 %v3212_v3  ;;  %1402 = vmatpush.msrb.mxu1 %v3226_v8 }
 0x14b   : > { %1366 = vmatpush.msrb.mxu3 %v3192_v60  ;;  %1386 = vmatpush.msrb.mxu0 %v3194_v61 }
 0x14c   : > { %1424 = vmatpush.msrb.mxu2 %v3224_v7  ;;  %1403 = vmatpush.msrb.mxu1 %v3238_v13 }
 0x14d   : > { %1367 = vmatpush.msrb.mxu3 %v3201_v63  ;;  %1387 = vmatpush.msrb.mxu0 %v3203_v0 }
 0x14e   : > { %1425 = vmatpush.msrb.mxu2 %v3236_v12  ;;  %1404 = vmatpush.msrb.mxu1 %v3250_v19 }
 0x14f   : > { %1368 = vmatpush.msrb.mxu3 %v3216_v5  ;;  %1388 = vmatpush.msrb.mxu0 %v3218_v6 }
 0x150   : > { %1426 = vmatpush.msrb.mxu2 %v3248_v17  ;;  %1405 = vmatpush.msrb.mxu1 %v3262_v23 }
 0x151   : > { %1369 = vmatpush.msrb.mxu3 %v3228_v9  ;;  %1389 = vmatpush.msrb.mxu0 %v3230_v11 }
 0x152   : > { %1427 = vmatpush.msrb.mxu2 %v3260_v22  ;;  %1406 = vmatpush.msrb.mxu1 %v3274_v27 }
 0x153   : > { %1370 = vmatpush.msrb.mxu3 %v3240_v15  ;;  %1390 = vmatpush.msrb.mxu0 %v3242_v16 }
 0x154   : > { %1428 = vmatpush.msrb.mxu2 %v3272_v26  ;;  %1407 = vmatpush.msrb.mxu1 %v3286_v14 }
 0x155   : > { %1371 = vmatpush.msrb.mxu3 %v3252_v20  ;;  %1391 = vmatpush.msrb.mxu0 %v3254_v21 }
 0x156   : > { %1429 = vmatpush.msrb.mxu2 %v3284_v32  ;;  %1408 = vmatpush.msrb.mxu1 %v3298_v18 }
 0x157   : > { %1372 = vmatpush.msrb.mxu3 %v3264_v10  ;;  %1392 = vmatpush.msrb.mxu0 %v3266_v25 }
 0x158   : > { %1430 = vmatpush.msrb.mxu2 %v3296_v35  ;;  %1409 = vmatpush.msrb.mxu1 %v3314_v40 }
 0x159   : > { %1373 = vmatpush.msrb.mxu3 %v3276_v28  ;;  %1393 = vmatpush.msrb.mxu0 %v3278_v29 }
 0x15a   : > { %1431 = vmatpush.msrb.mxu2 %v3311_v39  ;;  %1410 = vmatpush.msrb.mxu1 %v3322_v42 }
 0x15b   : > { %1374 = vmatpush.msrb.mxu3 %v3288_v33  ;;  %1394 = vmatpush.msrb.mxu0 %v3290_v34 }
 0x15c   : > { %1432 = vmatpush.msrb.mxu2 %v3320_v41  ;;  %1411 = vmatpush.msrb.mxu1 %v3328_v44 }
 0x15d   : > { %1375 = vmatpush.msrb.mxu3 %v3300_v36  ;;  %1395 = vmatpush.msrb.mxu0 %v3304_v38 }
 0x15e   : > { %1433 = vmatpush.msrb.mxu2 %v3326_v43  ;;  %1412 = vmatpush.msrb.mxu1 %v3336_v24 }
 0x15f   : > { %1496 = vmatpush.msra.mxu3 %v3156_v47  ;;  %1516 = vmatpush.msra.mxu0 %v3160_v49 }
 0x160   : > { %1434 = vmatpush.msrb.mxu2 %v3334_v45  ;;  %1413 = vmatpush.msrb.mxu1 %v3344_v30 }
 0x161   : > { %1497 = vmatpush.msra.mxu3 %v3158_v48  ;;  %1517 = vmatpush.msra.mxu0 %v3754_v37 }
 0x162   : > { %1435 = vmatpush.msrb.mxu2 %v3342_v46  ;;  %1414 = vmatpush.msrb.mxu1 %v3350_v31 }
 0x163   : > { %1498 = vmatpush.msra.mxu3 %v3166_v51  ;;  %1518 = vmatpush.msra.mxu0 %v3168_v52 }
 0x164   : > { %1556 = vmatpush.msra.mxu2 %v3190_v59  ;;  %1415 = vmatpush.msrb.mxu1 %v3357_v50 }
 0x165   : > { %1499 = vmatpush.msra.mxu3 %v3172_v53  ;;  %1519 = vmatpush.msra.mxu0 %v3174_v54 }
 0x166   : > { %1557 = vmatpush.msra.mxu2 %v3197_v62  ;;  %1536 = vmatpush.msra.mxu1 %v3208_v2 }
 0x167   : > { %1500 = vmatpush.msra.mxu3 %v3178_v55  ;;  %1520 = vmatpush.msra.mxu0 %v3180_v56 }
 0x168   : > { %1558 = vmatpush.msra.mxu2 %v3206_v1  ;;  %1537 = vmatpush.msra.mxu1 %v3214_v4 }
 0x169   : > { %1501 = vmatpush.msra.mxu3 %v3184_v57  ;;  %1521 = vmatpush.msra.mxu0 %v3186_v58 }
 0x16a   : > { %1559 = vmatpush.msra.mxu2 %v3212_v3  ;;  %1538 = vmatpush.msra.mxu1 %v3226_v8 }
 0x16b   : > { %1502 = vmatpush.msra.mxu3 %v3192_v60  ;;  %1522 = vmatpush.msra.mxu0 %v3194_v61 }
 0x16c   : > { %1560 = vmatpush.msra.mxu2 %v3224_v7  ;;  %1539 = vmatpush.msra.mxu1 %v3238_v13 }
 0x16d   : > { %1503 = vmatpush.msra.mxu3 %v3201_v63  ;;  %1523 = vmatpush.msra.mxu0 %v3203_v0 }
 0x16e   : > { %1561 = vmatpush.msra.mxu2 %v3236_v12  ;;  %1540 = vmatpush.msra.mxu1 %v3250_v19 }
 0x16f   : > { %1504 = vmatpush.msra.mxu3 %v3216_v5  ;;  %1524 = vmatpush.msra.mxu0 %v3218_v6 }
 0x170   : > { %1562 = vmatpush.msra.mxu2 %v3248_v17  ;;  %1541 = vmatpush.msra.mxu1 %v3262_v23 }
 0x171   : > { %1505 = vmatpush.msra.mxu3 %v3228_v9  ;;  %1525 = vmatpush.msra.mxu0 %v3230_v11  ;;  %v1358_v11 = vld [vmem:[#allocation2] sm:$0xff] }
 0x172   : > { %1563 = vmatpush.msra.mxu2 %v3260_v22  ;;  %1542 = vmatpush.msra.mxu1 %v3274_v27 }
 0x173   : > { %1506 = vmatpush.msra.mxu3 %v3240_v15  ;;  %1526 = vmatpush.msra.mxu0 %v3242_v16 }
 0x174   : > { %1564 = vmatpush.msra.mxu2 %v3272_v26  ;;  %1543 = vmatpush.msra.mxu1 %v3286_v14 }
 0x175   : > { %1507 = vmatpush.msra.mxu3 %v3252_v20  ;;  %1527 = vmatpush.msra.mxu0 %v3254_v21 }
 0x176   : > { %1565 = vmatpush.msra.mxu2 %v3284_v32  ;;  %1544 = vmatpush.msra.mxu1 %v3298_v18 }
 0x177   : > { %1508 = vmatpush.msra.mxu3 %v3264_v10  ;;  %1528 = vmatpush.msra.mxu0 %v3266_v25 }
 0x178   : > { %1566 = vmatpush.msra.mxu2 %v3296_v35  ;;  %1545 = vmatpush.msra.mxu1 %v3314_v40  ;;  %v3757_v40 = vld [vmem:[#allocation47_spill] sm:$0xff] }
 0x179   : > { %1509 = vmatpush.msra.mxu3 %v3276_v28  ;;  %1529 = vmatpush.msra.mxu0 %v3278_v29  ;;  %v1305_v29 = vld [vmem:[#allocation3] sm:$0xff] }
 0x17a   : > { %1567 = vmatpush.msra.mxu2 %v3311_v39  ;;  %1546 = vmatpush.msra.mxu1 %v3322_v42 }
 0x17b   : > { %1510 = vmatpush.msra.mxu3 %v3288_v33  ;;  %1530 = vmatpush.msra.mxu0 %v3290_v34  ;;  %v1306_v34 = vld [vmem:[#allocation3 + $0x38] sm:$0xff] }
 0x17c   : > { %1568 = vmatpush.msra.mxu2 %v3320_v41  ;;  %1547 = vmatpush.msra.mxu1 %v3328_v44 }
 0x17d   : > { %1511 = vmatpush.msra.mxu3 %v3300_v36  ;;  %1531 = vmatpush.msra.mxu0 %v3304_v38 }
 0x17e   : > { %1569 = vmatpush.msra.mxu2 %v3326_v43  ;;  %1548 = vmatpush.msra.mxu1 %v3336_v24 }
 0x180   : > { %1570 = vmatpush.msra.mxu2 %v3334_v45  ;;  %1549 = vmatpush.msra.mxu1 %v3344_v30 }
 0x182   : > { %1571 = vmatpush.msra.mxu2 %v3342_v46  ;;  %1550 = vmatpush.msra.mxu1 %v3350_v31 }
 0x184   : > { %1551 = vmatpush.msra.mxu1 %v3357_v50 }
 0x1bb   : > { %v1262_v36 = vpop.f32.mrf.mxu0 }
 0x1bc   : > { %v1309_v33 = vadd.f32 %v1306_v34, %v1262_v36 }
 0x1be   : > { %v2135_v38 = vmul.f32 -1.442695, %v1309_v33  ;;  %v3485_v33 = vld [vmem:[%s3755_s25] ss:$0 sm:$0xff] }
 0x1bf   : > { %3756 = vst [vmem:[#allocation32_spill] sm:$0xff] %v3485_v33 }
 0x1c0   : > { %2318 = vpow2.f32 %v2135_v38 }
 0x1c1   : > { %v1242_v28 = vpop.f32.mrf.mxu3 }
 0x1c2   : > { %v1308_v43 = vadd.f32 %v1305_v29, %v1242_v28 }
 0x1c4   : > { %v2134_v41 = vmul.f32 -1.442695, %v1308_v43  ;;  %v1282_v43 = vpop.f32.mrf.mxu1 }
 0x1c5   : > { %v1302_v28 = vpop.f32.mrf.mxu2 }
 0x1c6   : > { %v2319_v24 = vpop.eup %2318  ;;  %2320 = vpow2.f32 %v2134_v41  ;;  %v1349_v44 = vadd.f32 %v3485_v33, %v1302_v28 }
 0x1c7   : > { %v1317_v45 = vadd.f32 1.0, %v2319_v24  ;;  %v1307_v24 = vld [vmem:[#allocation3 + $0x50] sm:$0xff] }
 0x1c9   : > { %2322 = vrcp.f32 %v1317_v45  ;;  %vm1338_vm4 = vweird.f32 %v1317_v45  ;;  %v1344_v21 = vand.u32 2147483648, %v1317_v45 }
 0x1cc   : > { %v2321_v30 = vpop.eup %2320 }
 0x1cd   : > { %v1316_v25 = vadd.f32 1.0, %v2321_v30 }
 0x1cf   : > { %2324 = vrcp.f32 %v1316_v25  ;;  %v2323_v46 = vpop.eup %2322  ;;  %v1329_v29 = vand.u32 2147483648, %v1316_v25  ;;  %v1327_v38 = vand.u32 2147483647, %v1316_v25  ;;  %vm1323_vm3 = vweird.f32 %v1316_v25 }
 0x1d0   : > { %v1334_v31 = vmul.f32 %v2323_v46, %v1317_v45  ;;  %vm1339_vm5 = vweird.f32 %v2323_v46 }
 0x1d1   : > { %vm1328_vm7 = vcmp.eq.f32.partialorder %v1327_v38, 8.507059e+37  ;;  %vm1340_vm8 = vmor %vm1338_vm4, %vm1339_vm5 }
 0x1d2   : > { %v1335_v39 = vsub.f32 1.0, %v1334_v31  ;;  %v1330_v31 = vor.u32 1.1754944e-38, %v1329_v29 }
 0x1d4   : > { %v1336_v41 = vmul.f32 %v2323_v46, %v1335_v39  ;;  %v1345_v39 = vor.u32 1.1754944e-38, %v1344_v21 }
 0x1d5   : > { %v2325_v10 = vpop.eup %2324 }
 0x1d6   : > { %v1319_v50 = vmul.f32 %v2325_v10, %v1316_v25  ;;  %vm1324_vm2 = vweird.f32 %v2325_v10  ;;  %v1337_v42 = vadd.f32 %v2323_v46, %v1336_v41 }
 0x1d7   : > { %vm1325_vm6 = vmor %vm1323_vm3, %vm1324_vm2 }
 0x1d8   : > { %v1320_v34 = vsub.f32 1.0, %v1319_v50  ;;  %v1348_v50 = vadd.f32 %v1307_v24, %v1282_v43  ;;  %v1341_v32 = vsel %vm1340_vm8, %v2323_v46, %v1337_v42  ;;  %v1443_v24 = vld [vmem:[#allocation3 + $0x28] sm:$0xff] }
 0x1da   : > { %v1321_v36 = vmul.f32 %v2325_v10, %v1320_v34  ;;  %v1342_v34 = vand.u32 2147483647, %v1317_v45 }
 0x1dc   : > { %v1322_v30 = vadd.f32 %v2325_v10, %v1321_v36  ;;  %vm1343_vm9 = vcmp.eq.f32.partialorder %v1342_v34, 8.507059e+37 }
 0x1dd   : > { %v1346_v25 = vsel %vm1343_vm9, %v1345_v39, %v1341_v32 }
 0x1de   : > { %v1326_v20 = vsel %vm1325_vm6, %v2325_v10, %v1322_v30  ;;  %v1353_v28 = vsub.f32 1.0, %v1346_v25  ;;  %v1355_v29 = vmul.f32 %v1346_v25, %v3757_v40 }
 0x1df   : > { %v1331_v35 = vsel %vm1328_vm7, %v1330_v31, %v1326_v20 }
 0x1e0   : > { %v1350_v16 = vmul.f32 %v1349_v44, %v1331_v35 }
 0x1e2   : > { %v1351_v15 = vadd.f32 %v1350_v16, %v1348_v50  ;;  %v3785_v50 = vld [vmem:[#allocation32_spill] sm:$0xff] }
 0x1e4   : > { %2326 = vtanh.f32 %v1351_v15 }
 0x1ea   : > { %v2327_v36 = vpop.eup %2326 }
 0x1eb   : > { %v1354_v33 = vmul.f32 %v2327_v36, %v1353_v28 }
 0x1ed   : > { %v1356_v10 = vadd.f32 %v1355_v29, %v1354_v33 }
 0x1ef   : > { %v3489_v38 = vmul.f32 %v1358_v11, %v1356_v10  ;;  %v3784_v11 = vld [vmem:[#allocation57_spill] sm:$0xff] }
 0x1f1   : > { %1376 = vmatmul.f32.vlgmr.msrb.gmra.mxu3 %v3489_v38  ;;  %1396 = vmatmul.f32.vlgmr.msrb.gmra.mxu0 %v3489_v38 }
 0x1f2   : > { %1416 = vmatmul.f32.vlgmr.msrb.gmra.mxu1 %v3489_v38  ;;  %1436 = vmatmul.f32.vlgmr.msrb.gmra.mxu2 %v3489_v38 }
 0x1f3   : > { %1632 = vmatpush.msrb.mxu3 %v3156_v47  ;;  %1652 = vmatpush.msrb.mxu0 %v3160_v49  ;;  %v3758_v47 = vld [vmem:[#allocation33_spill] sm:$0xff]  ;;  %v3760_v49 = vld [vmem:[#allocation42_spill] sm:$0xff] }
 0x1f4   : > { %1672 = vmatpush.msrb.mxu1 %v3208_v2  ;;  %1692 = vmatpush.msrb.mxu2 %v3190_v59  ;;  %v3769_v59 = vld [vmem:[#allocation38_spill] sm:$0xff]  ;;  %v3776_v2 = vld [vmem:[#allocation53_spill] sm:$0xff] }
 0x1f5   : > { %1633 = vmatpush.msrb.mxu3 %v3158_v48  ;;  %1653 = vmatpush.msrb.mxu0 %v3754_v37  ;;  %v3759_v48 = vld [vmem:[#allocation50_spill] sm:$0xff] }
 0x1f6   : > { %1673 = vmatpush.msrb.mxu1 %v3214_v4  ;;  %1693 = vmatpush.msrb.mxu2 %v3197_v62  ;;  %v3772_v62 = vld [vmem:[#allocation51_spill] sm:$0xff]  ;;  %v3778_v4 = vld [vmem:[#allocation44_spill] sm:$0xff] }
 0x1f7   : > { %1634 = vmatpush.msrb.mxu3 %v3166_v51  ;;  %1654 = vmatpush.msrb.mxu0 %v3168_v52  ;;  %v3761_v51 = vld [vmem:[#allocation34_spill] sm:$0xff]  ;;  %v3762_v52 = vld [vmem:[#allocation35_spill] sm:$0xff] }
 0x1f8   : > { %1674 = vmatpush.msrb.mxu1 %v3226_v8  ;;  %1694 = vmatpush.msrb.mxu2 %v3206_v1  ;;  %v3775_v1 = vld [vmem:[#allocation58_spill] sm:$0xff]  ;;  %v3782_v8 = vld [vmem:[#allocation48_spill] sm:$0xff] }
 0x1f9   : > { %1635 = vmatpush.msrb.mxu3 %v3172_v53  ;;  %1655 = vmatpush.msrb.mxu0 %v3174_v54  ;;  %v3763_v53 = vld [vmem:[#allocation52_spill] sm:$0xff]  ;;  %v3764_v54 = vld [vmem:[#allocation45_spill] sm:$0xff] }
 0x1fa   : > { %1675 = vmatpush.msrb.mxu1 %v3238_v13  ;;  %1695 = vmatpush.msrb.mxu2 %v3212_v3  ;;  %v3777_v3 = vld [vmem:[#allocation43_spill] sm:$0xff] }
 0x1fb   : > { %1636 = vmatpush.msrb.mxu3 %v3178_v55  ;;  %1656 = vmatpush.msrb.mxu0 %v3180_v56  ;;  %v3765_v55 = vld [vmem:[#allocation36_spill] sm:$0xff]  ;;  %v3766_v56 = vld [vmem:[#allocation37_spill] sm:$0xff] }
 0x1fc   : > { %1676 = vmatpush.msrb.mxu1 %v3250_v19  ;;  %1696 = vmatpush.msrb.mxu2 %v3224_v7  ;;  %v3781_v7 = vld [vmem:[#allocation46_spill] sm:$0xff] }
 0x1fd   : > { %1637 = vmatpush.msrb.mxu3 %v3184_v57  ;;  %1657 = vmatpush.msrb.mxu0 %v3186_v58  ;;  %v3767_v57 = vld [vmem:[#allocation54_spill] sm:$0xff]  ;;  %v3768_v58 = vld [vmem:[#allocation49_spill] sm:$0xff] }
 0x1fe   : > { %1677 = vmatpush.msrb.mxu1 %v3262_v23  ;;  %1697 = vmatpush.msrb.mxu2 %v3236_v12  ;;  %v1442_v12 = vld [vmem:[#allocation3 + $0x30] sm:$0xff] }
 0x1ff   : > { %1638 = vmatpush.msrb.mxu3 %v3192_v60  ;;  %1658 = vmatpush.msrb.mxu0 %v3194_v61  ;;  %v3770_v60 = vld [vmem:[#allocation39_spill] sm:$0xff]  ;;  %v3771_v61 = vld [vmem:[#allocation56_spill] sm:$0xff] }
 0x200   : > { %1678 = vmatpush.msrb.mxu1 %v3274_v27  ;;  %1698 = vmatpush.msrb.mxu2 %v3248_v17  ;;  %v1441_v17 = vld [vmem:[#allocation3 + $0x18] sm:$0xff] }
 0x201   : > { %1639 = vmatpush.msrb.mxu3 %v3201_v63  ;;  %1659 = vmatpush.msrb.mxu0 %v3203_v0  ;;  %v3773_v63 = vld [vmem:[#allocation40_spill] sm:$0xff]  ;;  %v3774_v0 = vld [vmem:[#allocation41_spill] sm:$0xff] }
 0x202   : > { %1679 = vmatpush.msrb.mxu1 %v3286_v14  ;;  %1699 = vmatpush.msrb.mxu2 %v3260_v22 }
 0x203   : > { %1640 = vmatpush.msrb.mxu3 %v3216_v5  ;;  %1660 = vmatpush.msrb.mxu0 %v3218_v6  ;;  %v3779_v5 = vld [vmem:[#allocation59_spill] sm:$0xff] }
 0x204   : > { %1680 = vmatpush.msrb.mxu1 %v3298_v18  ;;  %1700 = vmatpush.msrb.mxu2 %v3272_v26  ;;  %v3780_v6 = vld [vmem:[#allocation55_spill] sm:$0xff] }
 0x205   : > { %1641 = vmatpush.msrb.mxu3 %v3228_v9  ;;  %1661 = vmatpush.msrb.mxu0 %v3758_v47  ;;  %v3783_v9 = vld [vmem:[#allocation60_spill] sm:$0xff] }
 0x206   : > { %1681 = vmatpush.msrb.mxu1 %v3759_v48  ;;  %1701 = vmatpush.msrb.mxu2 %v3760_v49 }
 0x207   : > { %1642 = vmatpush.msrb.mxu3 %v3761_v51  ;;  %1662 = vmatpush.msrb.mxu0 %v3762_v52 }
 0x208   : > { %1682 = vmatpush.msrb.mxu1 %v3763_v53  ;;  %1702 = vmatpush.msrb.mxu2 %v3764_v54 }
 0x209   : > { %1643 = vmatpush.msrb.mxu3 %v3765_v55  ;;  %1663 = vmatpush.msrb.mxu0 %v3766_v56  ;;  %v1494_v56 = vld [vmem:[#allocation2 + $0x18] sm:$0xff] }
 0x20a   : > { %1683 = vmatpush.msrb.mxu1 %v3767_v57  ;;  %1703 = vmatpush.msrb.mxu2 %v3768_v58 }
 0x20b   : > { %1644 = vmatpush.msrb.mxu3 %v3769_v59  ;;  %1664 = vmatpush.msrb.mxu0 %v3770_v60  ;;  %v1578_v59 = vld [vmem:[#allocation3 + $0x40] sm:$0xff] }
 0x20c   : > { %1684 = vmatpush.msrb.mxu1 %v3771_v61  ;;  %1704 = vmatpush.msrb.mxu2 %v3772_v62 }
 0x20d   : > { %1645 = vmatpush.msrb.mxu3 %v3773_v63  ;;  %1665 = vmatpush.msrb.mxu0 %v3774_v0  ;;  %v1577_v63 = vld [vmem:[#allocation3 + $0x8] sm:$0xff] }
 0x20e   : > { %1685 = vmatpush.msrb.mxu1 %v3775_v1  ;;  %1705 = vmatpush.msrb.mxu2 %v3776_v2 }
 0x20f   : > { %1646 = vmatpush.msrb.mxu3 %v3777_v3  ;;  %1666 = vmatpush.msrb.mxu0 %v3778_v4 }
 0x210   : > { %1686 = vmatpush.msrb.mxu1 %v3779_v5  ;;  %1706 = vmatpush.msrb.mxu2 %v3780_v6 }
 0x211   : > { %1647 = vmatpush.msrb.mxu3 %v3781_v7  ;;  %1667 = vmatpush.msrb.mxu0 %v3782_v8 }
 0x212   : > { %1687 = vmatpush.msrb.mxu1 %v3783_v9  ;;  %1707 = vmatpush.msrb.mxu2 %v3784_v11 }
 0x26e   : > { %v1397_v13 = vpop.f32.mrf.mxu0 }
 0x26f   : > { %v1445_v15 = vadd.f32 %v1442_v12, %v1397_v13  ;;  %v1417_v43 = vpop.f32.mrf.mxu1 }
 0x270   : > { %v1484_v36 = vadd.f32 %v1443_v24, %v1417_v43 }
 0x271   : > { %v2137_v16 = vmul.f32 -1.442695, %v1445_v15 }
 0x273   : > { %2328 = vpow2.f32 %v2137_v16 }
 0x274   : > { %v1377_v19 = vpop.f32.mrf.mxu3 }
 0x275   : > { %v1444_v20 = vadd.f32 %v1441_v17, %v1377_v19  ;;  %v1437_v33 = vpop.f32.mrf.mxu2 }
 0x276   : > { %v1485_v34 = vadd.f32 %v3785_v50, %v1437_v33 }
 0x277   : > { %v2136_v21 = vmul.f32 -1.442695, %v1444_v20 }
 0x279   : > { %v2329_v22 = vpop.eup %2328  ;;  %2330 = vpow2.f32 %v2136_v21 }
 0x27a   : > { %v1453_v23 = vadd.f32 1.0, %v2329_v22  ;;  %v1579_v22 = vld [vmem:[#allocation3 + $0x20] sm:$0xff] }
 0x27c   : > { %2332 = vrcp.f32 %v1453_v23  ;;  %v1480_v28 = vand.u32 2147483648, %v1453_v23  ;;  %vm1474_vm15 = vweird.f32 %v1453_v23  ;;  %v1478_v10 = vand.u32 2147483647, %v1453_v23 }
 0x27e   : > { %v1481_v49 = vor.u32 1.1754944e-38, %v1480_v28  ;;  %vm1479_vm1 = vcmp.eq.f32.partialorder %v1478_v10, 8.507059e+37 }
 0x27f   : > { %v2331_v26 = vpop.eup %2330 }
 0x280   : > { %v1452_v27 = vadd.f32 1.0, %v2331_v26 }
 0x282   : > { %2334 = vrcp.f32 %v1452_v27  ;;  %v2333_v32 = vpop.eup %2332  ;;  %v1465_v42 = vand.u32 2147483648, %v1452_v27  ;;  %v1463_v45 = vand.u32 2147483647, %v1452_v27  ;;  %vm1459_vm11 = vweird.f32 %v1452_v27 }
 0x283   : > { %v1470_v14 = vmul.f32 %v2333_v32, %v1453_v23  ;;  %vm1475_vm14 = vweird.f32 %v2333_v32 }
 0x284   : > { %v1466_v30 = vor.u32 1.1754944e-38, %v1465_v42  ;;  %vm1464_vm13 = vcmp.eq.f32.partialorder %v1463_v45, 8.507059e+37  ;;  %vm1476_vm0 = vmor %vm1474_vm15, %vm1475_vm14 }
 0x285   : > { %v1471_v37 = vsub.f32 1.0, %v1470_v14 }
 0x287   : > { %v1472_v46 = vmul.f32 %v2333_v32, %v1471_v37 }
 0x288   : > { %v2335_v35 = vpop.eup %2334 }
 0x289   : > { %v1455_v18 = vmul.f32 %v2335_v35, %v1452_v27  ;;  %vm1460_vm10 = vweird.f32 %v2335_v35  ;;  %v1473_v39 = vadd.f32 %v2333_v32, %v1472_v46 }
 0x28a   : > { %vm1461_vm12 = vmor %vm1459_vm11, %vm1460_vm10 }
 0x28b   : > { %v1456_v40 = vsub.f32 1.0, %v1455_v18  ;;  %v1477_v48 = vsel %vm1476_vm0, %v2333_v32, %v1473_v39  ;;  %v1714_v39 = vld [vmem:[#allocation3 + $0x58] sm:$0xff] }
 0x28c   : > { %v1482_v51 = vsel %vm1479_vm1, %v1481_v49, %v1477_v48 }
 0x28d   : > { %v1457_v44 = vmul.f32 %v2335_v35, %v1456_v40  ;;  %v1489_v52 = vsub.f32 1.0, %v1482_v51  ;;  %v1491_v55 = vmul.f32 %v1482_v51, %v3489_v38 }
 0x28f   : > { %v1458_v41 = vadd.f32 %v2335_v35, %v1457_v44 }
 0x291   : > { %v1462_v31 = vsel %vm1461_vm12, %v2335_v35, %v1458_v41 }
 0x292   : > { %v1467_v25 = vsel %vm1464_vm13, %v1466_v30, %v1462_v31  ;;  %v1630_v30 = vld [vmem:[#allocation2 + $0x8] sm:$0xff] }
 0x293   : > { %v1486_v29 = vmul.f32 %v1485_v34, %v1467_v25 }
 0x295   : > { %v1487_v47 = vadd.f32 %v1486_v29, %v1484_v36  ;;  %v1713_v29 = vld [vmem:[#allocation3 + $0x48] sm:$0xff] }
 0x297   : > { %2336 = vtanh.f32 %v1487_v47 }
 0x29d   : > { %v2337_v53 = vpop.eup %2336 }
 0x29e   : > { %v1490_v54 = vmul.f32 %v2337_v53, %v1489_v52 }
 0x2a0   : > { %v1492_v57 = vadd.f32 %v1491_v55, %v1490_v54 }
 0x2a2   : > { %v1495_v58 = vmul.f32 %v1494_v56, %v1492_v57 }
 0x2a4   : > { %1512 = vmatmul.f32.vlgmr.msra.gmra.mxu3 %v1495_v58  ;;  %1532 = vmatmul.f32.vlgmr.msra.gmra.mxu0 %v1495_v58 }
 0x2a5   : > { %1552 = vmatmul.f32.vlgmr.msra.gmra.mxu1 %v1495_v58  ;;  %1572 = vmatmul.f32.vlgmr.msra.gmra.mxu2 %v1495_v58 }
 0x321   : > { %v1533_v60 = vpop.f32.mrf.mxu0 }
 0x322   : > { %v1581_v61 = vadd.f32 %v1578_v59, %v1533_v60  ;;  %v1553_v21 = vpop.f32.mrf.mxu1 }
 0x323   : > { %v1620_v18 = vadd.f32 %v1579_v22, %v1553_v21 }
 0x324   : > { %v2139_v62 = vmul.f32 -1.442695, %v1581_v61 }
 0x326   : > { %2338 = vpow2.f32 %v2139_v62 }
 0x327   : > { %v1513_v0 = vpop.f32.mrf.mxu3 }
 0x328   : > { %v1580_v1 = vadd.f32 %v1577_v63, %v1513_v0  ;;  %v1573_v19 = vpop.f32.mrf.mxu2 }
 0x329   : > { %v1621_v27 = vadd.f32 %v3785_v50, %v1573_v19 }
 0x32a   : > { %v2138_v2 = vmul.f32 -1.442695, %v1580_v1 }
 0x32c   : > { %v2339_v3 = vpop.eup %2338  ;;  %2340 = vpow2.f32 %v2138_v2 }
 0x32d   : > { %v1589_v4 = vadd.f32 1.0, %v2339_v3  ;;  %v1715_v3 = vld [vmem:[#allocation3 + $0x10] sm:$0xff] }
 0x32f   : > { %2342 = vrcp.f32 %v1589_v4  ;;  %v1616_v35 = vand.u32 2147483648, %v1589_v4  ;;  %vm1610_vm7 = vweird.f32 %v1589_v4  ;;  %v1614_v40 = vand.u32 2147483647, %v1589_v4 }
 0x331   : > { %v1617_v45 = vor.u32 1.1754944e-38, %v1616_v35  ;;  %vm1615_vm9 = vcmp.eq.f32.partialorder %v1614_v40, 8.507059e+37 }
 0x332   : > { %v2341_v38 = vpop.eup %2340 }
 0x333   : > { %v1588_v5 = vadd.f32 1.0, %v2341_v38 }
 0x335   : > { %2344 = vrcp.f32 %v1588_v5  ;;  %v2343_v6 = vpop.eup %2342  ;;  %v1601_v13 = vand.u32 2147483648, %v1588_v5  ;;  %v1599_v16 = vand.u32 2147483647, %v1588_v5  ;;  %vm1595_vm3 = vweird.f32 %v1588_v5 }
 0x336   : > { %v1606_v7 = vmul.f32 %v2343_v6, %v1589_v4  ;;  %vm1611_vm6 = vweird.f32 %v2343_v6 }
 0x337   : > { %v1602_v23 = vor.u32 1.1754944e-38, %v1601_v13  ;;  %vm1600_vm5 = vcmp.eq.f32.partialorder %v1599_v16, 8.507059e+37  ;;  %vm1612_vm8 = vmor %vm1610_vm7, %vm1611_vm6 }
 0x338   : > { %v1607_v11 = vsub.f32 1.0, %v1606_v7 }
 0x33a   : > { %v1608_v17 = vmul.f32 %v2343_v6, %v1607_v11 }
 0x33b   : > { %v2345_v8 = vpop.eup %2344 }
 0x33c   : > { %v1591_v9 = vmul.f32 %v2345_v8, %v1588_v5  ;;  %vm1596_vm2 = vweird.f32 %v2345_v8  ;;  %v1609_v32 = vadd.f32 %v2343_v6, %v1608_v17 }
 0x33d   : > { %vm1597_vm4 = vmor %vm1595_vm3, %vm1596_vm2 }
 0x33e   : > { %v1592_v12 = vsub.f32 1.0, %v1591_v9  ;;  %v1613_v44 = vsel %vm1612_vm8, %v2343_v6, %v1609_v32 }
 0x33f   : > { %v1618_v46 = vsel %vm1615_vm9, %v1617_v45, %v1613_v44 }
 0x340   : > { %v1593_v15 = vmul.f32 %v2345_v8, %v1592_v12  ;;  %v1625_v33 = vsub.f32 1.0, %v1618_v46  ;;  %v1627_v24 = vmul.f32 %v1618_v46, %v1495_v58 }
 0x342   : > { %v1594_v20 = vadd.f32 %v2345_v8, %v1593_v15 }
 0x344   : > { %v1598_v26 = vsel %vm1597_vm4, %v2345_v8, %v1594_v20 }
 0x345   : > { %v1603_v14 = vsel %vm1600_vm5, %v1602_v23, %v1598_v26 }
 0x346   : > { %v1622_v37 = vmul.f32 %v1621_v27, %v1603_v14 }
 0x348   : > { %v1623_v42 = vadd.f32 %v1622_v37, %v1620_v18 }
 0x34a   : > { %2346 = vtanh.f32 %v1623_v42 }
 0x350   : > { %v2347_v41 = vpop.eup %2346 }
 0x351   : > { %v1626_v43 = vmul.f32 %v2347_v41, %v1625_v33 }
 0x353   : > { %v1628_v31 = vadd.f32 %v1627_v24, %v1626_v43 }
 0x355   : > { %v1631_v34 = vmul.f32 %v1630_v30, %v1628_v31 }
 0x357   : > { %1648 = vmatmul.f32.vlgmr.msrb.gmra.mxu3 %v1631_v34  ;;  %1668 = vmatmul.f32.vlgmr.msrb.gmra.mxu0 %v1631_v34 }
 0x358   : > { %1688 = vmatmul.f32.vlgmr.msrb.gmra.mxu1 %v1631_v34  ;;  %1708 = vmatmul.f32.vlgmr.msrb.gmra.mxu2 %v1631_v34 }
 0x3d4   : > { %v1669_v25 = vpop.f32.mrf.mxu0 }
 0x3d5   : > { %v1717_v28 = vadd.f32 %v1714_v39, %v1669_v25  ;;  %v1689_v2 = vpop.f32.mrf.mxu1 }
 0x3d6   : > { %v1756_v9 = vadd.f32 %v1715_v3, %v1689_v2 }
 0x3d7   : > { %v2141_v36 = vmul.f32 -1.442695, %v1717_v28 }
 0x3d9   : > { %2348 = vpow2.f32 %v2141_v36 }
 0x3da   : > { %v1649_v10 = vpop.f32.mrf.mxu3 }
 0x3db   : > { %v1716_v47 = vadd.f32 %v1713_v29, %v1649_v10  ;;  %v1709_v0 = vpop.f32.mrf.mxu2 }
 0x3dc   : > { %v1757_v5 = vadd.f32 %v3785_v50, %v1709_v0 }
 0x3dd   : > { %v2140_v48 = vmul.f32 -1.442695, %v1716_v47 }
 0x3df   : > { %v2349_v49 = vpop.eup %2348  ;;  %2350 = vpow2.f32 %v2140_v48 }
 0x3e0   : > { %v1725_v51 = vadd.f32 1.0, %v2349_v49 }
 0x3e2   : > { %2352 = vrcp.f32 %v1725_v51  ;;  %v1752_v8 = vand.u32 2147483648, %v1725_v51  ;;  %vm1746_vm15 = vweird.f32 %v1725_v51  ;;  %v1750_v12 = vand.u32 2147483647, %v1725_v51 }
 0x3e4   : > { %v1753_v16 = vor.u32 1.1754944e-38, %v1752_v8  ;;  %vm1751_vm1 = vcmp.eq.f32.partialorder %v1750_v12, 8.507059e+37 }
 0x3e5   : > { %v2351_v52 = vpop.eup %2350 }
 0x3e6   : > { %v1724_v53 = vadd.f32 1.0, %v2351_v52 }
 0x3e8   : > { %2354 = vrcp.f32 %v1724_v53  ;;  %v2353_v54 = vpop.eup %2352  ;;  %v1737_v60 = vand.u32 2147483648, %v1724_v53  ;;  %v1735_v62 = vand.u32 2147483647, %v1724_v53  ;;  %vm1731_vm11 = vweird.f32 %v1724_v53 }
 0x3e9   : > { %v1742_v55 = vmul.f32 %v2353_v54, %v1725_v51  ;;  %vm1747_vm14 = vweird.f32 %v2353_v54 }
 0x3ea   : > { %v1738_v4 = vor.u32 1.1754944e-38, %v1737_v60  ;;  %vm1736_vm13 = vcmp.eq.f32.partialorder %v1735_v62, 8.507059e+37  ;;  %vm1748_vm0 = vmor %vm1746_vm15, %vm1747_vm14 }
 0x3eb   : > { %v1743_v58 = vsub.f32 1.0, %v1742_v55 }
 0x3ed   : > { %v1744_v63 = vmul.f32 %v2353_v54, %v1743_v58 }
 0x3ee   : > { %v2355_v56 = vpop.eup %2354 }
 0x3ef   : > { %v1727_v57 = vmul.f32 %v2355_v56, %v1724_v53  ;;  %vm1732_vm10 = vweird.f32 %v2355_v56  ;;  %v1745_v6 = vadd.f32 %v2353_v54, %v1744_v63 }
 0x3f0   : > { %vm1733_vm12 = vmor %vm1731_vm11, %vm1732_vm10 }
 0x3f1   : > { %v1728_v59 = vsub.f32 1.0, %v1727_v57  ;;  %v1749_v15 = vsel %vm1748_vm0, %v2353_v54, %v1745_v6 }
 0x3f2   : > { %v1754_v17 = vsel %vm1751_vm1, %v1753_v16, %v1749_v15 }
 0x3f3   : > { %v1729_v61 = vmul.f32 %v2355_v56, %v1728_v59  ;;  %v1761_v19 = vsub.f32 1.0, %v1754_v17  ;;  %v1763_v22 = vmul.f32 %v1754_v17, %v1631_v34 }
 0x3f5   : > { %v1730_v1 = vadd.f32 %v2355_v56, %v1729_v61 }
 0x3f7   : > { %v1734_v38 = vsel %vm1733_vm12, %v2355_v56, %v1730_v1 }
 0x3f8   : > { %v1739_v7 = vsel %vm1736_vm13, %v1738_v4, %v1734_v38 }
 0x3f9   : > { %v1758_v11 = vmul.f32 %v1757_v5, %v1739_v7 }
 0x3fb   : > { %v1759_v13 = vadd.f32 %v1758_v11, %v1756_v9 }
 0x3fd   : > { %2356 = vtanh.f32 %v1759_v13 }
 0x403   : > { %v2357_v20 = vpop.eup %2356 }
 0x404   : > { %v1762_v21 = vmul.f32 %v2357_v20, %v1761_v19  ;;  %1769 = sbr.rel (%p2142_p2) target bundleno = 1458 (0x5b2), region = 120 }
 0x406   : > { %v1764_v50 = vadd.f32 %v1763_v22, %v1762_v21 }
 0x408   : > { %1765 = vst [vmem:[#allocation4] sm:$0xff] %v1764_v50 }
 0x409   : > { %v1787_v23 = vld [vmem:[%s3787_s17 + $0x78] sm:$0xff]  ;;  %v1786_v26 = vld [vmem:[%s3787_s17 + $0x70] sm:$0xff]  ;;  %v1785_v27 = vld [vmem:[%s3787_s17 + $0x68] sm:$0xff]  ;;  %vm1812_vm2 = vcmask 31744  }
 0x40a   : > { %1792 = vmatpush.msra.mxu0 %v1787_v23  ;;  %v1784_v32 = vld [vmem:[%s3787_s17 + $0x60] sm:$0xff]  ;;  %v1783_v35 = vld [vmem:[%s3787_s17 + $0x58] sm:$0xff]  ;;  %v1782_v18 = vld [vmem:[%s3787_s17 + $0x50] sm:$0xff] }
 0x40b   : > { %v1781_v37 = vld [vmem:[%s3787_s17 + $0x48] sm:$0xff]  ;;  %v1780_v40 = vld [vmem:[%s3787_s17 + $0x40] sm:$0xff]  ;;  %v1779_v42 = vld [vmem:[%s3787_s17 + $0x38] sm:$0xff] }
 0x40c   : > { %1793 = vmatpush.msra.mxu0 %v1786_v26  ;;  %v1778_v44 = vld [vmem:[%s3787_s17 + $0x30] sm:$0xff]  ;;  %v1777_v45 = vld [vmem:[%s3787_s17 + $0x28] sm:$0xff]  ;;  %v1776_v46 = vld [vmem:[%s3787_s17 + $0x20] sm:$0xff] }
 0x40d   : > { %v1775_v33 = vld [vmem:[%s3787_s17 + $0x18] sm:$0xff]  ;;  %v1774_v41 = vld [vmem:[%s3787_s17 + $0x10] sm:$0xff]  ;;  %v1773_v43 = vld [vmem:[%s3787_s17 + $0x8] sm:$0xff] }
 0x40e   : > { %1794 = vmatpush.msra.mxu0 %v1785_v27  ;;  %v1772_v24 = vld [vmem:[%s3787_s17] sm:$0xff] }
 0x40f   : > { %v1770_v14 = vld [vmem:[#allocation4] sm:$0xff] }
 0x410   : > { %1771 = vst [vmem:[#allocation20] sm:$0xff] %v1770_v14  ;;  %1795 = vmatpush.msra.mxu0 %v1784_v32  ;;  %v2358_v30 = vld [vmem:[%s3788_s26] ss:$0 sm:$0xff] }
 0x412   : > { %1796 = vmatpush.msra.mxu0 %v1783_v35 }
 0x414   : > { %1797 = vmatpush.msra.mxu0 %v1782_v18 }
 0x416   : > { %1798 = vmatpush.msra.mxu0 %v1781_v37 }
 0x418   : > { %1799 = vmatpush.msra.mxu0 %v1780_v40 }
 0x41a   : > { %1800 = vmatpush.msra.mxu0 %v1779_v42 }
 0x41c   : > { %1801 = vmatpush.msra.mxu0 %v1778_v44 }
 0x41e   : > { %1802 = vmatpush.msra.mxu0 %v1777_v45 }
 0x420   : > { %1803 = vmatpush.msra.mxu0 %v1776_v46 }
 0x422   : > { %1804 = vmatpush.msra.mxu0 %v1775_v33 }
 0x424   : > { %1805 = vmatpush.msra.mxu0 %v1774_v41 }
 0x426   : > { %1806 = vmatpush.msra.mxu0 %v1773_v43 }
 0x428   : > { %1807 = vmatpush.msra.mxu0 %v1772_v24 }
 0x429   : > { %1808 = vmatmul.f32.vlgmr.msra.gmra.mxu0 %v1770_v14 }
 0x4a6   : > { %v1809_v31 = vpop.f32.mrf.mxu0 }
 0x4a7   : > { %v1810_v34 = vadd.f32 %v2358_v30, %v1809_v31 }
 0x4a9   : > { %v1813_v39 = vsel %vm1812_vm2, %v1810_v34, -inf }
 0x4aa   : > { %1814 = vmax.xlane.f32.xlu0 %v1813_v39 }
 0x51d   : > { %v1815_v25 = vpop.xlane.xlu0 %1814 }
 0x51e   : > { %v1816_v28 = vsub.f32 %v1810_v34, %v1815_v25 }
 0x520   : > { %v1817_v36 = vmul.f32 1.442695, %v1816_v28 }
 0x522   : > { %2359 = vpow2.f32 %v1817_v36 }
 0x528   : > { %v2360_v29 = vpop.eup %2359 }
 0x529   : > { %v1819_v10 = vsel %vm1812_vm2, %v2360_v29, 0.0 }
 0x52a   : > { %1820 = vadd.xlane.f32.xlu0 %v1819_v10 }
 0x59d   : > { %v1821_v47 = vpop.xlane.xlu0 %1820 }
 0x59e   : > { %2361 = vrcp.f32 %v1821_v47  ;;  %v1833_v52 = vand.u32 2147483648, %v1821_v47  ;;  %v1831_v54 = vand.u32 2147483647, %v1821_v47  ;;  %vm1827_vm4 = vweird.f32 %v1821_v47 }
 0x5a0   : > { %v1834_v56 = vor.u32 1.1754944e-38, %v1833_v52  ;;  %vm1832_vm6 = vcmp.eq.f32.partialorder %v1831_v54, 8.507059e+37 }
 0x5a4   : > { %v2362_v48 = vpop.eup %2361 }
 0x5a5   : > { %v1823_v49 = vmul.f32 %v2362_v48, %v1821_v47  ;;  %vm1828_vm3 = vweird.f32 %v2362_v48 }
 0x5a6   : > { %vm1829_vm5 = vmor %vm1827_vm4, %vm1828_vm3 }
 0x5a7   : > { %v1824_v51 = vsub.f32 1.0, %v1823_v49 }
 0x5a9   : > { %v1825_v53 = vmul.f32 %v2362_v48, %v1824_v51 }
 0x5ab   : > { %v1826_v55 = vadd.f32 %v2362_v48, %v1825_v53 }
 0x5ad   : > { %v1830_v57 = vsel %vm1829_vm5, %v2362_v48, %v1826_v55 }
 0x5ae   : > { %v1835_v58 = vsel %vm1832_vm6, %v1834_v56, %v1830_v57 }
 0x5af   : > { %v1836_v59 = vmul.f32 %v2360_v29, %v1835_v58 }
 0x5b1   : > { %1837 = vst.msk [vmem:[%s3789_s29] sm:$0xff] %vm1812_vm2, %v1836_v59 }
 0x5b2 PF: > { %p2236_p3 = scmp.eq.s32.totalorder %s2859_s24, 1  ;;  %s3790_s1 = sld [smem:[#allocation70_spill]] }
 0x5b3   : > { %s2749_s27 = smov [#allocation20]  }
 0x5b4   : > { %s1853_s18 = sshll.u32 %s2749_s27, 4  ;;  %s1854_s18 = int_to_ptr.vmem [resolvable:$true] %s1853_s18 }
 0x5b8   : > { %s1855_s12 = sshll.u32 %s3790_s1, 4  ;;  %s1856_s12 = int_to_ptr.hbm [resolvable:$true] %s1855_s12 }
 0x5b9   : > { %2193 = dma.vmem_to_hbm [thread:$0]  (%p2236_p3), %s1854_s18, 128, %s1856_s12, [#allocation7]  }
 0x5ba   : > { %2710 = dma.done.wait (%p2236_p3), [#allocation7], 128  }
 0x5bb   : > { %2712 = vsyncadd (%p2236_p3), [#allocation7], 4294967168 }
 0x5bc PF: > { %s38_s23 = sadd.s32 1, %s2735_s23   ;;  %s3791_s4 = sld [smem:[#allocation31_spill]] }
 0x5bd   : > { %p35_p4 = scmp.ge.s32.totalorder %s38_s23, 4   ;;  %s3792_s21 = sld [smem:[#allocation29_spill]] }
 0x5be   : > { %s3793_s22 = sld [smem:[#allocation30_spill]]  ;;  %s3794_s18 = smov %s2719_s19 }
 0x5bf   : > { %s3795_s19 = smov %s2723_s20  ;;  %37 = sbr.rel (!%p35_p4) target bundleno = 22 (0x16), region = 200 }
 0x5c2   : > { %s3796_s20 = smov %s3791_s4 }
 0x5c4   :  { %1876 = vsyncpa [#allocation6], 1 }
 0x5c5   :  { %1878 = vsyncpa [#allocation6 + $0x1], 1 }
 0x5c6   :  { %1879 = vsyncpa [#allocation9], 1 }
 0x5c7   :  { %1881 = vsyncpa [#allocation9 + $0x1], 1 }
 0x5c8   :  { %1882 = vsyncpa [#allocation12], 1 }
 0x5c9   :  { %1884 = vsyncpa [#allocation12 + $0x1], 1 }
 0x5ca   :  { %1885 = vsyncpa [#allocation15], 1 }
 0x5cb   :  { %1886 = vsyncpa [#allocation18], 1 }
 0x5cc   :  { %1887 = vsyncpa [#allocation7], 1 }
 0x5cd   :  { %1889 = vsyncpa [#allocation7 + $0x1], 1 }

</bundles_post_ra>
